<compile_context>
chip_gen: v7x
topology: tpu7x:2x2x1
jax: 0.10.0
libtpu: 0.0.40
codegen_flags: <defaults>
</compile_context>

<pallas_src>
import functools

import jax
import jax.numpy as jnp
from jax.experimental import pallas as pl
from jax.experimental.pallas import tpu as pltpu

_EPS = 1e-5                 # nn.BatchNorm2d default eps
_LANE = 128                 # lane width / channel padding granularity
_TILE_M_MAX = 2048          # upper bound on rows per M tile
_TILE_BUDGET = 24 << 20     # per-step VMEM working-set target (bytes)
_VMEM_LIMIT = 48 << 20      # scoped VMEM limit (<= v7x 64 MiB physical)


def _rup(x, m):
    return ((x + m - 1) // m) * m


def _params(n_axes=1):
    return pltpu.CompilerParams(
        dimension_semantics=("parallel",) * n_axes,
        vmem_limit_bytes=_VMEM_LIMIT)


def _ce(flops, nbytes):
    return pl.CostEstimate(flops=int(flops), transcendentals=0,
                           bytes_accessed=int(nbytes))


def _choose_tile_m(m, row_bytes, resident_bytes):
    """Pick an M-tile: as big as possible within the VMEM working-set budget."""
    avail = max(_TILE_BUDGET - resident_bytes, 2 << 20)
    t = avail // max(2 * row_bytes, 1)          # 2x: double-buffered pipeline
    t = int(min(t, _TILE_M_MAX, _rup(m, 8)))
    return max(8, (t // 8) * 8)


# ---------------------------------------------------------------------------
# Pallas kernels
# ---------------------------------------------------------------------------
def _matmul_stats_kernel(x_ref, w_ref, y_ref, st_ref):
    """y = x @ w (bf16 MXU, f32 acc); emit per-tile per-channel sum / sum-sq."""
    y = jnp.dot(x_ref[...], w_ref[...], preferred_element_type=jnp.float32)
    y_ref[...] = y.astype(y_ref.dtype)
    st_ref[...] = jnp.concatenate(
        [jnp.sum(y, axis=0, keepdims=True),
         jnp.sum(y * y, axis=0, keepdims=True)], axis=0)[None]


def _matmul_stats_ds_kernel(x_ref, w_ref, y1_ref, yd_ref, st1_ref, std_ref,
                            *, f1p):
    """Stage-1 + downsample branch as ONE wide matmul x @ [w1 | wd].

    Shares the streamed x tile and fills the 256-wide MXU; the two results are
    split on a lane-aligned (128-multiple) boundary.  yd is written to HBM in
    bf16 so stage 4 never recomputes the downsample matmul.
    """
    y = jnp.dot(x_ref[...], w_ref[...], preferred_element_type=jnp.float32)
    y1 = y[:, :f1p]
    yd = y[:, f1p:]
    y1_ref[...] = y1.astype(y1_ref.dtype)
    yd_ref[...] = yd.astype(yd_ref.dtype)
    st1_ref[...] = jnp.concatenate(
        [jnp.sum(y1, axis=0, keepdims=True),
         jnp.sum(y1 * y1, axis=0, keepdims=True)], axis=0)[None]
    std_ref[...] = jnp.concatenate(
        [jnp.sum(yd, axis=0, keepdims=True),
         jnp.sum(yd * yd, axis=0, keepdims=True)], axis=0)[None]


def _conv3x3_kernel(x_ref, sc_ref, bi_ref, w2_ref, y_ref, st_ref):
    """3x3 conv (stride 1, pad 1) over one image with fused BN1 + ReLU.

    x_ref : (1, Hs, Ws, C1p) raw (pre-BN) stage-1 output.
    The BN1 affine + ReLU runs in f32, is cast to bf16 ONCE, then the three
    column shifts are packed along the lane axis into an (Hs+2, Ws, 3*C1p)
    slab (zero pad ring built in VMEM — no HBM pad / mask).  The conv is then
    3 wide-K MXU matmuls (one per row tap) accumulated in f32.  Also emits
    per-image BN2 partial stats on the f32 accumulator.
    """
    hs, ws, cin = x_ref.shape[1], x_ref.shape[2], x_ref.shape[3]
    cout = w2_ref.shape[-1]

    xa = jnp.maximum(
        x_ref[0].astype(jnp.float32) * sc_ref[...] + bi_ref[...], 0.0)
    xb = xa.astype(jnp.bfloat16)                      # single hoisted cast

    # lane-packed column shifts: [dw=0 | dw=1 | dw=2]  -> (hs, ws, 3*cin)
    zc = jnp.zeros((hs, 1, cin), jnp.bfloat16)
    slab = jnp.concatenate(
        [jnp.concatenate([zc, xb[:, :ws - 1, :]], axis=1),    # dw = 0
         xb,                                                  # dw = 1
         jnp.concatenate([xb[:, 1:, :], zc], axis=1)],        # dw = 2
        axis=-1)
    zr = jnp.zeros((1, ws, 3 * cin), jnp.bfloat16)
    slab = jnp.concatenate([zr, slab, zr], axis=0)            # (hs+2, ws, 3cin)

    acc = jnp.zeros((hs * ws, cout), jnp.float32)
    for dh in range(3):                                       # 3 wide MXU dots
        blk = slab[dh:dh + hs].reshape(hs * ws, 3 * cin)
        acc = acc + jnp.dot(blk, w2_ref[dh],
                            preferred_element_type=jnp.float32)

    y_ref[...] = acc[None].astype(y_ref.dtype)
    st_ref[...] = jnp.concatenate(
        [jnp.sum(acc, axis=0, keepdims=True),
         jnp.sum(acc * acc, axis=0, keepdims=True)], axis=0)[None]


def _bn_relu_matmul_kernel(x_ref, sc_ref, bi_ref, w_ref, y_ref, st_ref,
                           *, tile_m, m_true, need_mask):
    """Stage-3: y = ReLU(BN2(x_raw)) @ w, plus BN3 partial stats (BN2 folded)."""
    xa = jnp.maximum(
        x_ref[...].astype(jnp.float32) * sc_ref[...] + bi_ref[...], 0.0)
    if need_mask:  # zero M-padding rows so they don't pollute BN3 stats
        rows = (jax.lax.broadcasted_iota(jnp.int32, (tile_m, 1), 0)
                + pl.program_id(0) * tile_m)
        xa = jnp.where(rows < m_true, xa, 0.0)
    y = jnp.dot(xa.astype(jnp.bfloat16), w_ref[...],
                preferred_element_type=jnp.float32)
    y_ref[...] = y.astype(y_ref.dtype)
    st_ref[...] = jnp.concatenate(
        [jnp.sum(y, axis=0, keepdims=True),
         jnp.sum(y * y, axis=0, keepdims=True)], axis=0)[None]


def _final_ds_kernel(y3_ref, yd_ref, s3_ref, b3_ref, sd_ref, bd_ref, o_ref):
    """out = ReLU(BN3(y3_raw) + BNd(yd_raw)); downsample read back (no recompute)."""
    y = y3_ref[...].astype(jnp.float32) * s3_ref[...] + b3_ref[...]
    idr = yd_ref[...].astype(jnp.float32) * sd_ref[...] + bd_ref[...]
    o_ref[...] = jnp.maximum(y + idr, 0.0).astype(o_ref.dtype)


def _final_id_kernel(y3_ref, x_ref, s3_ref, b3_ref, o_ref):
    """out = ReLU(BN3(y3_raw) + identity)."""
    # Identity residual is the bf16 copy of x (matches the bf16 inter-stage
    # convention; ~1-ulp-of-bf16 systematic loss vs. PyTorch's f32 add).
    y = y3_ref[...].astype(jnp.float32) * s3_ref[...] + b3_ref[...]
    o_ref[...] = jnp.maximum(y + x_ref[...].astype(jnp.float32),
                             0.0).astype(o_ref.dtype)


# ---------------------------------------------------------------------------
# BatchNorm stats -> per-channel affine (tiny XLA glue)
# ---------------------------------------------------------------------------
def _pad_vec(v, cp, fill):
    v = v.astype(jnp.float32)
    if v.shape[0] == cp:
        return v
    return jnp.concatenate([v, jnp.full((cp - v.shape[0],), fill, jnp.float32)])


def _bn_affine(partial_stats, gamma, beta, count, cp):
    """Fold train-mode BN (global batch stats) into per-channel scale / bias."""
    s = jnp.sum(partial_stats, axis=0)                # (2, Cp)
    mu = s[0] / count
    # single-pass E[y^2]-E[y]^2 in f32, clamped >= 0 (catastrophic cancellation
    # is negligible at these activation scales).
    var = jnp.maximum(s[1] / count - mu * mu, 0.0)
    scale = _pad_vec(gamma, cp, 1.0) * jax.lax.rsqrt(var + _EPS)
    bias = _pad_vec(beta, cp, 0.0) - mu * scale
    return scale.reshape(1, cp), bias.reshape(1, cp)


# ---------------------------------------------------------------------------
# Bottleneck forward
# ---------------------------------------------------------------------------
def init_bottleneck_params(key, in_channels, filters):
    """Deterministic synthetic parameters with PyTorch-convention shapes."""
    F1, F2, F3 = filters
    ks = jax.random.split(key, 12)
    return {
        # conv weights: (Cout, Cin, kh, kw) like torch.nn.Conv2d
        "w1": jax.random.normal(ks[0], (F1, in_channels, 1, 1), jnp.float32) * 0.1,
        "w2": jax.random.normal(ks[1], (F2, F1, 3, 3), jnp.float32) * 0.1,
        "w3": jax.random.normal(ks[2], (F3, F2, 1, 1), jnp.float32) * 0.1,
        "wd": jax.random.normal(ks[3], (F3, in_channels, 1, 1), jnp.float32) * 0.1,
        # BatchNorm affine params
        "g1": 1.0 + 0.1 * jax.random.normal(ks[4], (F1,), jnp.float32),
        "b1": 0.1 * jax.random.normal(ks[5], (F1,), jnp.float32),
        "g2": 1.0 + 0.1 * jax.random.normal(ks[6], (F2,), jnp.float32),
        "b2": 0.1 * jax.random.normal(ks[7], (F2,), jnp.float32),
        "g3": 1.0 + 0.1 * jax.random.normal(ks[8], (F3,), jnp.float32),
        "b3": 0.1 * jax.random.normal(ks[9], (F3,), jnp.float32),
        "gd": 1.0 + 0.1 * jax.random.normal(ks[10], (F3,), jnp.float32),
        "bd": 0.1 * jax.random.normal(ks[11], (F3,), jnp.float32),
    }


def bottleneck_forward(x_nchw, params, in_channels, filters, stride):
    F1, F2, F3 = filters
    N, C, H, W = x_nchw.shape
    assert C == in_channels
    downsample = (stride != 1) or (C != F3)

    # lane-dense channel padding (multiples of 128)
    Cp = _rup(C, _LANE)
    F1p, F2p, F3p = _rup(F1, _LANE), _rup(F2, _LANE), _rup(F3, _LANE)

    # TODO(synk): fold the NCHW->NHWC transpose and the ::stride subsample into
    # the stage-1 BlockSpec (strided / Element index_map) and keep the block API
    # NHWC so these wrapper HBM passes hoist to network boundaries.
    x = jnp.transpose(x_nchw, (0, 2, 3, 1))
    xs = x[:, ::stride, ::stride, :]
    Hs, Ws = xs.shape[1], xs.shape[2]
    M = N * Hs * Ws

    row_bytes = 2 * (Cp + F1p + F2p + 3 * F3p)            # bf16 rows, all stages
    resident = 2 * (Cp * (F1p + F3p) + F2p * F3p)         # resident bf16 weights
    tile_m = _choose_tile_m(M, row_bytes, resident)
    Mp = _rup(M, tile_m)
    n_tiles = Mp // tile_m

    # bf16 MXU operands; matmuls accumulate in f32.  Zero padding keeps padded
    # channels / rows exactly zero through every stage.
    x2d = jnp.pad(xs.reshape(M, C),
                  ((0, Mp - M), (0, Cp - C))).astype(jnp.bfloat16)
    w1p = jnp.pad(params["w1"][:, :, 0, 0].T,
                  ((0, Cp - C), (0, F1p - F1))).astype(jnp.bfloat16)
    # (kh, kw, Cin, Cout) -> per-row-tap lane-packed weights (3, 3*F1p, F2p)
    w2t = jnp.pad(jnp.transpose(params["w2"], (2, 3, 1, 0)),
                  ((0, 0), (0, 0), (0, F1p - F1), (0, F2p - F2)))
    w2p = w2t.reshape(3, 3 * F1p, F2p).astype(jnp.bfloat16)
    w3p = jnp.pad(params["w3"][:, :, 0, 0].T,
                  ((0, F2p - F2), (0, F3p - F3))).astype(jnp.bfloat16)

    row_spec = lambda c: pl.BlockSpec((tile_m, c), lambda i: (i, 0))
    full2 = lambda a, b: pl.BlockSpec((a, b), lambda i: (0, 0))
    stat_spec = lambda c: pl.BlockSpec((1, 2, c), lambda i: (i, 0, 0))

    # ---- stage 1: 1x1 conv (downsample branch fused into one wide matmul) ---
    if downsample:
        wdp = jnp.pad(params["wd"][:, :, 0, 0].T,
                      ((0, Cp - C), (0, F3p - F3))).astype(jnp.bfloat16)
        w1d = jnp.concatenate([w1p, wdp], axis=1)             # (Cp, F1p+F3p)
        y1_raw, yd_raw, st1, std = pl.pallas_call(
            functools.partial(_matmul_stats_ds_kernel, f1p=F1p),
            grid=(n_tiles,),
            in_specs=[row_spec(Cp), full2(Cp, F1p + F3p)],
            out_specs=(row_spec(F1p), row_spec(F3p),
                       stat_spec(F1p), stat_spec(F3p)),
            out_shape=(jax.ShapeDtypeStruct((Mp, F1p), jnp.bfloat16),
                       jax.ShapeDtypeStruct((Mp, F3p), jnp.bfloat16),
                       jax.ShapeDtypeStruct((n_tiles, 2, F1p), jnp.float32),
                       jax.ShapeDtypeStruct((n_tiles, 2, F3p), jnp.float32)),
            compiler_params=_params(),
            cost_estimate=_ce(2 * Mp * Cp * (F1p + F3p),
                              2 * (Mp * (Cp + F1p + F3p) + Cp * (F1p + F3p))),
        )(x2d, w1d)
    else:
        y1_raw, st1 = pl.pallas_call(
            _matmul_stats_kernel,
            grid=(n_tiles,),
            in_specs=[row_spec(Cp), full2(Cp, F1p)],
            out_specs=(row_spec(F1p), stat_spec(F1p)),
            out_shape=(jax.ShapeDtypeStruct((Mp, F1p), jnp.bfloat16),
                       jax.ShapeDtypeStruct((n_tiles, 2, F1p), jnp.float32)),
            compiler_params=_params(),
            cost_estimate=_ce(2 * Mp * Cp * F1p,
                              2 * (Mp * (Cp + F1p) + Cp * F1p)),
        )(x2d, w1p)
    scale1, bias1 = _bn_affine(st1, params["g1"], params["b1"], float(M), F1p)

    # ---- stage 2: 3x3 conv, one image per grid step, BN1+ReLU folded in -----
    y1_img = y1_raw[:M].reshape(N, Hs, Ws, F1p)
    # TODO(synk): tile large feature maps into row strips (grid=(N, n_strips))
    # with a 1-row halo to deepen the pipeline / improve megacore balance.
    y2_raw, st2 = pl.pallas_call(
        _conv3x3_kernel,
        grid=(N,),
        in_specs=[pl.BlockSpec((1, Hs, Ws, F1p), lambda n: (n, 0, 0, 0)),
                  pl.BlockSpec((1, F1p), lambda n: (0, 0)),
                  pl.BlockSpec((1, F1p), lambda n: (0, 0)),
                  pl.BlockSpec((3, 3 * F1p, F2p), lambda n: (0, 0, 0))],
        out_specs=(pl.BlockSpec((1, Hs * Ws, F2p), lambda n: (n, 0, 0)),
                   pl.BlockSpec((1, 2, F2p), lambda n: (n, 0, 0))),
        out_shape=(jax.ShapeDtypeStruct((N, Hs * Ws, F2p), jnp.bfloat16),
                   jax.ShapeDtypeStruct((N, 2, F2p), jnp.float32)),
        compiler_params=_params(),
        cost_estimate=_ce(2 * 9 * M * F1p * F2p,
                          2 * (M * F1p + 9 * F1p * F2p + M * F2p)),
    )(y1_img, scale1, bias1, w2p)
    scale2, bias2 = _bn_affine(st2, params["g2"], params["b2"], float(M), F2p)

    # ---- stage 3: 1x1 conv, tiled over M, BN2+ReLU folded in ----------------
    y2_flat = y2_raw.reshape(M, F2p)
    if Mp != M:
        y2_flat = jnp.pad(y2_flat, ((0, Mp - M), (0, 0)))
    y3_raw, st3 = pl.pallas_call(
        functools.partial(_bn_relu_matmul_kernel, tile_m=tile_m, m_true=M,
                          need_mask=(Mp != M)),
        grid=(n_tiles,),
        in_specs=[row_spec(F2p), full2(1, F2p), full2(1, F2p),
                  full2(F2p, F3p)],
        out_specs=(row_spec(F3p), stat_spec(F3p)),
        out_shape=(jax.ShapeDtypeStruct((Mp, F3p), jnp.bfloat16),
                   jax.ShapeDtypeStruct((n_tiles, 2, F3p), jnp.float32)),
        compiler_params=_params(),
        cost_estimate=_ce(2 * Mp * F2p * F3p,
                          2 * (Mp * (F2p + F3p) + F2p * F3p)),
    )(y2_flat, scale2, bias2, w3p)
    scale3, bias3 = _bn_affine(st3, params["g3"], params["b3"], float(M), F3p)

    # ---- stage 4: BN3 + residual (+ BNd on stored downsample) + ReLU --------
    if downsample:
        scaled, biasd = _bn_affine(std, params["gd"], params["bd"], float(M),
                                   F3p)
        out2d = pl.pallas_call(
            _final_ds_kernel,
            grid=(n_tiles,),
            in_specs=[row_spec(F3p), row_spec(F3p), full2(1, F3p),
                      full2(1, F3p), full2(1, F3p), full2(1, F3p)],
            out_specs=row_spec(F3p),
            out_shape=jax.ShapeDtypeStruct((Mp, F3p), jnp.bfloat16),
            compiler_params=_params(),
            cost_estimate=_ce(6 * Mp * F3p, 6 * Mp * F3p),
        )(y3_raw, yd_raw, scale3, bias3, scaled, biasd)
    else:
        out2d = pl.pallas_call(
            _final_id_kernel,
            grid=(n_tiles,),
            in_specs=[row_spec(F3p), row_spec(Cp), full2(1, F3p),
                      full2(1, F3p)],
            out_specs=row_spec(F3p),
            out_shape=jax.ShapeDtypeStruct((Mp, F3p), jnp.bfloat16),
            compiler_params=_params(),
            cost_estimate=_ce(4 * Mp * F3p, 6 * Mp * F3p),
        )(y3_raw, x2d, scale3, bias3)

    out = out2d[:M, :F3].reshape(N, Hs, Ws, F3)
    return jnp.transpose(out, (0, 3, 1, 2)).astype(x_nchw.dtype)   # back to NCHW


# ---------------------------------------------------------------------------
# Pure-JAX reference (high-precision convs) for correctness check
# ---------------------------------------------------------------------------
def _ref_forward(x, p, in_channels, filters, stride):
    F1, F2, F3 = filters

    def conv(x, w, s, pad):
        return jax.lax.conv_general_dilated(
            x, w, (s, s), [(pad, pad), (pad, pad)],
            dimension_numbers=("NCHW", "OIHW", "NCHW"),
            precision=jax.lax.Precision.HIGHEST)

    def bn(y, g, b):
        mu = jnp.mean(y, axis=(0, 2, 3), keepdims=True)
        var = jnp.mean((y - mu) ** 2, axis=(0, 2, 3), keepdims=True)
        return ((y - mu) * jax.lax.rsqrt(var + _EPS)
                * g[None, :, None, None] + b[None, :, None, None])

    out = jax.nn.relu(bn(conv(x, p["w1"], stride, 0), p["g1"], p["b1"]))
    out = jax.nn.relu(bn(conv(out, p["w2"], 1, 1), p["g2"], p["b2"]))
    out = bn(conv(out, p["w3"], 1, 0), p["g3"], p["b3"])
    if stride != 1 or in_channels != F3:
        identity = bn(conv(x, p["wd"], stride, 0), p["gd"], p["bd"])
    else:
        identity = x
    return jax.nn.relu(out + identity)


# ---------------------------------------------------------------------------
if __name__ == "__main__":
    key = jax.random.PRNGKey(0)
    k_x, k_p, k_x2, k_p2 = jax.random.split(key, 4)

    # config 1: stride-2 bottleneck with downsample branch
    in_channels, filters, stride = 4, (4, 4, 8), 2
    x = jax.random.normal(k_x, (2, in_channels, 16, 16), jnp.float32)
    params = init_bottleneck_params(k_p, in_channels, filters)
    fwd = jax.jit(functools.partial(bottleneck_forward, in_channels=in_channels,
                                    filters=filters, stride=stride))
    out = jax.block_until_ready(fwd(x, params))
    ref = _ref_forward(x, params, in_channels, filters, stride)
    assert out.shape == ref.shape == (2, filters[2], 8, 8)
    # bf16 MXU operands / bf16 inter-stage + output vs. f32 HIGHEST reference
    assert jnp.allclose(out, ref, rtol=5e-2, atol=5e-2), \
        float(jnp.max(jnp.abs(out - ref)))

    # config 2: identity (no-downsample) path
    in_channels2, filters2, stride2 = 8, (4, 4, 8), 1
    x2 = jax.random.normal(k_x2, (2, in_channels2, 16, 16), jnp.float32)
    params2 = init_bottleneck_params(k_p2, in_channels2, filters2)
    fwd2 = jax.jit(functools.partial(bottleneck_forward,
                                     in_channels=in_channels2,
                                     filters=filters2, stride=stride2))
    out2 = jax.block_until_ready(fwd2(x2, params2))
    ref2 = _ref_forward(x2, params2, in_channels2, filters2, stride2)
    assert out2.shape == ref2.shape == (2, filters2[2], 16, 16)
    assert jnp.allclose(out2, ref2, rtol=5e-2, atol=5e-2), \
        float(jnp.max(jnp.abs(out2 - ref2)))

    print("KERNEL_OK")
</pallas_src>

<mosaic_0001>
module attributes {stable_mosaic.version = 11 : i64} {
  func.func @_matmul_stats_ds_kernel(%arg0: i32, %arg1: memref<128x128xbf16, #tpu.memory_space<vmem>>, %arg2: memref<128x256xbf16, #tpu.memory_space<vmem>>, %arg3: memref<128x128xbf16, #tpu.memory_space<vmem>>, %arg4: memref<128x128xbf16, #tpu.memory_space<vmem>>, %arg5: memref<1x2x128xf32, #tpu.memory_space<vmem>>, %arg6: memref<1x2x128xf32, #tpu.memory_space<vmem>>) attributes {dimension_semantics = [#tpu.dimension_semantics<parallel>], iteration_bounds = array<i64: 1>, scalar_prefetch = 0 : i64, scratch_operands = 0 : i64, tpu.core_type = #tpu.core_type<tc>, window_params = [{transform_indices = @transform_0, window_bounds = array<i64: 128, 128>}, {pipeline_mode = #tpu.pipeline_mode<synchronous>, transform_indices = @transform_1, window_bounds = array<i64: 128, 256>}, {transform_indices = @transform_2, window_bounds = array<i64: 128, 128>}, {transform_indices = @transform_3, window_bounds = array<i64: 128, 128>}, {transform_indices = @transform_4, window_bounds = array<i64: 1, 2, 128>}, {transform_indices = @transform_5, window_bounds = array<i64: 1, 2, 128>}]} {
    %c0 = arith.constant 0 : index
    %c0_0 = arith.constant 0 : index
    %0 = vector.load %arg1[%c0, %c0_0] : memref<128x128xbf16, #tpu.memory_space<vmem>>, vector<128x128xbf16>
    %c0_1 = arith.constant 0 : index
    %c0_2 = arith.constant 0 : index
    %1 = vector.load %arg2[%c0_1, %c0_2] : memref<128x256xbf16, #tpu.memory_space<vmem>>, vector<128x256xbf16>
    %cst = arith.constant dense<0.000000e+00> : vector<128x256xf32>
    %2 = tpu.matmul %0, %1, %cst {dimension_numbers = #tpu.dot_dimension_numbers<[1], [0], [0], [1], [0, 0, 1, 1], [], []>} : vector<128x128xbf16>, vector<128x256xbf16>, vector<128x256xf32> -> vector<128x256xf32>
    %3 = vector.extract_strided_slice %2 {offsets = [0, 0], sizes = [128, 128], strides = [1, 1]} : vector<128x256xf32> to vector<128x128xf32>
    %4 = vector.extract_strided_slice %2 {offsets = [0, 128], sizes = [128, 128], strides = [1, 1]} : vector<128x256xf32> to vector<128x128xf32>
    %5 = arith.truncf %3 : vector<128x128xf32> to vector<128x128xbf16>
    %c0_3 = arith.constant 0 : index
    %c0_4 = arith.constant 0 : index
    %6 = vector.load %arg3[%c0_3, %c0_4] : memref<128x128xbf16, #tpu.memory_space<vmem>>, vector<128x128xbf16>
    tpu.vector_store %arg3[%c0_3, %c0_4], %5 {strides = array<i32>} : memref<128x128xbf16, #tpu.memory_space<vmem>>, vector<128x128xbf16>,
    %7 = arith.truncf %4 : vector<128x128xf32> to vector<128x128xbf16>
    %c0_5 = arith.constant 0 : index
    %c0_6 = arith.constant 0 : index
    %8 = vector.load %arg4[%c0_5, %c0_6] : memref<128x128xbf16, #tpu.memory_space<vmem>>, vector<128x128xbf16>
    tpu.vector_store %arg4[%c0_5, %c0_6], %7 {strides = array<i32>} : memref<128x128xbf16, #tpu.memory_space<vmem>>, vector<128x128xbf16>,
    %cst_7 = arith.constant dense<0.000000e+00> : vector<128xf32>
    %9 = vector.multi_reduction <add>, %3, %cst_7 [0] : vector<128x128xf32> to vector<128xf32>
    %10 = vector.shape_cast %9 : vector<128xf32> to vector<1x128xf32>
    %11 = arith.mulf %3, %3 : vector<128x128xf32>
    %cst_8 = arith.constant dense<0.000000e+00> : vector<128xf32>
    %12 = vector.multi_reduction <add>, %11, %cst_8 [0] : vector<128x128xf32> to vector<128xf32>
    %13 = vector.shape_cast %12 : vector<128xf32> to vector<1x128xf32>
    %14 = tpu.concatenate %10, %13 in 0 : vector<1x128xf32>, vector<1x128xf32> -> vector<2x128xf32>
    %15 = vector.shape_cast %14 : vector<2x128xf32> to vector<1x2x128xf32>
    %c0_9 = arith.constant 0 : index
    %c0_10 = arith.constant 0 : index
    %c0_11 = arith.constant 0 : index
    %16 = vector.load %arg5[%c0_9, %c0_10, %c0_11] : memref<1x2x128xf32, #tpu.memory_space<vmem>>, vector<1x2x128xf32>
    tpu.vector_store %arg5[%c0_9, %c0_10, %c0_11], %15 {strides = array<i32>} : memref<1x2x128xf32, #tpu.memory_space<vmem>>, vector<1x2x128xf32>,
    %cst_12 = arith.constant dense<0.000000e+00> : vector<128xf32>
    %17 = vector.multi_reduction <add>, %4, %cst_12 [0] : vector<128x128xf32> to vector<128xf32>
    %18 = vector.shape_cast %17 : vector<128xf32> to vector<1x128xf32>
    %19 = arith.mulf %4, %4 : vector<128x128xf32>
    %cst_13 = arith.constant dense<0.000000e+00> : vector<128xf32>
    %20 = vector.multi_reduction <add>, %19, %cst_13 [0] : vector<128x128xf32> to vector<128xf32>
    %21 = vector.shape_cast %20 : vector<128xf32> to vector<1x128xf32>
    %22 = tpu.concatenate %18, %21 in 0 : vector<1x128xf32>, vector<1x128xf32> -> vector<2x128xf32>
    %23 = vector.shape_cast %22 : vector<2x128xf32> to vector<1x2x128xf32>
    %c0_14 = arith.constant 0 : index
    %c0_15 = arith.constant 0 : index
    %c0_16 = arith.constant 0 : index
    %24 = vector.load %arg6[%c0_14, %c0_15, %c0_16] : memref<1x2x128xf32, #tpu.memory_space<vmem>>, vector<1x2x128xf32>
    tpu.vector_store %arg6[%c0_14, %c0_15, %c0_16], %23 {strides = array<i32>} : memref<1x2x128xf32, #tpu.memory_space<vmem>>, vector<1x2x128xf32>,
    return
  }
  func.func @transform_0(%arg0: i32) -> (i32, i32) {
    %c0_i32 = arith.constant 0 : i32
    %c0_i32_0 = arith.constant 0 : i32
    return %arg0, %c0_i32 : i32, i32
  }
  func.func @transform_1(%arg0: i32) -> (i32, i32) {
    %c0_i32 = arith.constant 0 : i32
    %c0_i32_0 = arith.constant 0 : i32
    %c0_i32_1 = arith.constant 0 : i32
    return %c0_i32, %c0_i32_0 : i32, i32
  }
  func.func @transform_2(%arg0: i32) -> (i32, i32) {
    %c0_i32 = arith.constant 0 : i32
    %c0_i32_0 = arith.constant 0 : i32
    return %arg0, %c0_i32 : i32, i32
  }
  func.func @transform_3(%arg0: i32) -> (i32, i32) {
    %c0_i32 = arith.constant 0 : i32
    %c0_i32_0 = arith.constant 0 : i32
    return %arg0, %c0_i32 : i32, i32
  }
  func.func @transform_4(%arg0: i32) -> (i32, i32, i32) {
    %c0_i32 = arith.constant 0 : i32
    %c0_i32_0 = arith.constant 0 : i32
    %c0_i32_1 = arith.constant 0 : i32
    return %arg0, %c0_i32, %c0_i32_0 : i32, i32, i32
  }
  func.func @transform_5(%arg0: i32) -> (i32, i32, i32) {
    %c0_i32 = arith.constant 0 : i32
    %c0_i32_0 = arith.constant 0 : i32
    %c0_i32_1 = arith.constant 0 : i32
    return %arg0, %c0_i32, %c0_i32_0 : i32, i32, i32
  }
}

module attributes {stable_mosaic.version = 11 : i64} {
  func.func @_conv3x3_kernel(%arg0: i32, %arg1: memref<1x8x8x128xbf16, #tpu.memory_space<vmem>>, %arg2: memref<1x128xf32, #tpu.memory_space<vmem>>, %arg3: memref<1x128xf32, #tpu.memory_space<vmem>>, %arg4: memref<3x384x128xbf16, #tpu.memory_space<vmem>>, %arg5: memref<1x64x128xbf16, #tpu.memory_space<vmem>>, %arg6: memref<1x2x128xf32, #tpu.memory_space<vmem>>) attributes {dimension_semantics = [#tpu.dimension_semantics<parallel>], iteration_bounds = array<i64: 2>, scalar_prefetch = 0 : i64, scratch_operands = 0 : i64, tpu.core_type = #tpu.core_type<tc>, window_params = [{transform_indices = @transform_0, window_bounds = array<i64: 1, 8, 8, 128>}, {pipeline_mode = #tpu.pipeline_mode<synchronous>, transform_indices = @transform_1, window_bounds = array<i64: 1, 128>}, {pipeline_mode = #tpu.pipeline_mode<synchronous>, transform_indices = @transform_2, window_bounds = array<i64: 1, 128>}, {pipeline_mode = #tpu.pipeline_mode<synchronous>, transform_indices = @transform_3, window_bounds = array<i64: 3, 384, 128>}, {transform_indices = @transform_4, window_bounds = array<i64: 1, 64, 128>}, {transform_indices = @transform_5, window_bounds = array<i64: 1, 2, 128>}]} {
    %c0 = arith.constant 0 : index
    %c0_0 = arith.constant 0 : index
    %c0_1 = arith.constant 0 : index
    %c0_2 = arith.constant 0 : index
    %0 = vector.load %arg1[%c0, %c0_0, %c0_1, %c0_2] : memref<1x8x8x128xbf16, #tpu.memory_space<vmem>>, vector<1x8x8x128xbf16>
    %1 = vector.shape_cast %0 : vector<1x8x8x128xbf16> to vector<8x8x128xbf16>
    %2 = arith.extf %1 : vector<8x8x128xbf16> to vector<8x8x128xf32>
    %c0_3 = arith.constant 0 : index
    %c0_4 = arith.constant 0 : index
    %3 = vector.load %arg2[%c0_3, %c0_4] : memref<1x128xf32, #tpu.memory_space<vmem>>, vector<1x128xf32>
    %4 = vector.shape_cast %3 : vector<1x128xf32> to vector<1x1x128xf32>
    %5 = vector.broadcast %4 : vector<1x1x128xf32> to vector<8x8x128xf32>
    %6 = arith.mulf %2, %5 : vector<8x8x128xf32>
    %c0_5 = arith.constant 0 : index
    %c0_6 = arith.constant 0 : index
    %7 = vector.load %arg3[%c0_5, %c0_6] : memref<1x128xf32, #tpu.memory_space<vmem>>, vector<1x128xf32>
    %8 = vector.shape_cast %7 : vector<1x128xf32> to vector<1x1x128xf32>
    %9 = vector.broadcast %8 : vector<1x1x128xf32> to vector<8x8x128xf32>
    %10 = arith.addf %6, %9 : vector<8x8x128xf32>
    %cst = arith.constant 0.000000e+00 : f32
    %11 = vector.broadcast %cst : f32 to vector<8x8x128xf32>
    %12 = arith.maximumf %10, %11 : vector<8x8x128xf32>
    %13 = arith.truncf %12 : vector<8x8x128xf32> to vector<8x8x128xbf16>
    %cst_7 = arith.constant 0.000000e+00 : bf16
    %14 = vector.broadcast %cst_7 : bf16 to vector<8x1x128xbf16>
    %15 = vector.extract_strided_slice %13 {offsets = [0, 0, 0], sizes = [8, 7, 128], strides = [1, 1, 1]} : vector<8x8x128xbf16> to vector<8x7x128xbf16>
    %16 = tpu.concatenate %14, %15 in 1 : vector<8x1x128xbf16>, vector<8x7x128xbf16> -> vector<8x8x128xbf16>
    %17 = vector.extract_strided_slice %13 {offsets = [0, 1, 0], sizes = [8, 7, 128], strides = [1, 1, 1]} : vector<8x8x128xbf16> to vector<8x7x128xbf16>
    %18 = tpu.concatenate %17, %14 in 1 : vector<8x7x128xbf16>, vector<8x1x128xbf16> -> vector<8x8x128xbf16>
    %19 = tpu.concatenate %16, %13, %18 in 2 : vector<8x8x128xbf16>, vector<8x8x128xbf16>, vector<8x8x128xbf16> -> vector<8x8x384xbf16>
    %cst_8 = arith.constant 0.000000e+00 : bf16
    %20 = vector.broadcast %cst_8 : bf16 to vector<1x8x384xbf16>
    %21 = tpu.concatenate %20, %19, %20 in 0 : vector<1x8x384xbf16>, vector<8x8x384xbf16>, vector<1x8x384xbf16> -> vector<10x8x384xbf16>
    %cst_9 = arith.constant 0.000000e+00 : f32
    %22 = vector.broadcast %cst_9 : f32 to vector<64x128xf32>
    %23 = vector.extract_strided_slice %21 {offsets = [0, 0, 0], sizes = [8, 8, 384], strides = [1, 1, 1]} : vector<10x8x384xbf16> to vector<8x8x384xbf16>
    %24 = vector.shape_cast %23 : vector<8x8x384xbf16> to vector<64x384xbf16>
    %c0_10 = arith.constant 0 : index
    %c0_11 = arith.constant 0 : index
    %c0_12 = arith.constant 0 : index
    %25 = vector.load %arg4[%c0_10, %c0_11, %c0_12] : memref<3x384x128xbf16, #tpu.memory_space<vmem>>, vector<1x384x128xbf16>
    %26 = vector.shape_cast %25 : vector<1x384x128xbf16> to vector<384x128xbf16>
    %cst_13 = arith.constant dense<0.000000e+00> : vector<64x128xf32>
    %27 = tpu.matmul %24, %26, %cst_13 {dimension_numbers = #tpu.dot_dimension_numbers<[1], [0], [0], [1], [0, 0, 1, 1], [], []>} : vector<64x384xbf16>, vector<384x128xbf16>, vector<64x128xf32> -> vector<64x128xf32>
    %28 = arith.addf %22, %27 : vector<64x128xf32>
    %29 = vector.extract_strided_slice %21 {offsets = [1, 0, 0], sizes = [8, 8, 384], strides = [1, 1, 1]} : vector<10x8x384xbf16> to vector<8x8x384xbf16>
    %30 = vector.shape_cast %29 : vector<8x8x384xbf16> to vector<64x384xbf16>
    %c1 = arith.constant 1 : index
    %c0_14 = arith.constant 0 : index
    %c0_15 = arith.constant 0 : index
    %31 = vector.load %arg4[%c1, %c0_14, %c0_15] : memref<3x384x128xbf16, #tpu.memory_space<vmem>>, vector<1x384x128xbf16>
    %32 = vector.shape_cast %31 : vector<1x384x128xbf16> to vector<384x128xbf16>
    %cst_16 = arith.constant dense<0.000000e+00> : vector<64x128xf32>
    %33 = tpu.matmul %30, %32, %cst_16 {dimension_numbers = #tpu.dot_dimension_numbers<[1], [0], [0], [1], [0, 0, 1, 1], [], []>} : vector<64x384xbf16>, vector<384x128xbf16>, vector<64x128xf32> -> vector<64x128xf32>
    %34 = arith.addf %28, %33 : vector<64x128xf32>
    %35 = vector.extract_strided_slice %21 {offsets = [2, 0, 0], sizes = [8, 8, 384], strides = [1, 1, 1]} : vector<10x8x384xbf16> to vector<8x8x384xbf16>
    %36 = vector.shape_cast %35 : vector<8x8x384xbf16> to vector<64x384xbf16>
    %c2 = arith.constant 2 : index
    %c0_17 = arith.constant 0 : index
    %c0_18 = arith.constant 0 : index
    %37 = vector.load %arg4[%c2, %c0_17, %c0_18] : memref<3x384x128xbf16, #tpu.memory_space<vmem>>, vector<1x384x128xbf16>
    %38 = vector.shape_cast %37 : vector<1x384x128xbf16> to vector<384x128xbf16>
    %cst_19 = arith.constant dense<0.000000e+00> : vector<64x128xf32>
    %39 = tpu.matmul %36, %38, %cst_19 {dimension_numbers = #tpu.dot_dimension_numbers<[1], [0], [0], [1], [0, 0, 1, 1], [], []>} : vector<64x384xbf16>, vector<384x128xbf16>, vector<64x128xf32> -> vector<64x128xf32>
    %40 = arith.addf %34, %39 : vector<64x128xf32>
    %41 = vector.shape_cast %40 : vector<64x128xf32> to vector<1x64x128xf32>
    %42 = arith.truncf %41 : vector<1x64x128xf32> to vector<1x64x128xbf16>
    %c0_20 = arith.constant 0 : index
    %c0_21 = arith.constant 0 : index
    %c0_22 = arith.constant 0 : index
    %43 = vector.load %arg5[%c0_20, %c0_21, %c0_22] : memref<1x64x128xbf16, #tpu.memory_space<vmem>>, vector<1x64x128xbf16>
    tpu.vector_store %arg5[%c0_20, %c0_21, %c0_22], %42 {strides = array<i32>} : memref<1x64x128xbf16, #tpu.memory_space<vmem>>, vector<1x64x128xbf16>,
    %cst_23 = arith.constant dense<0.000000e+00> : vector<128xf32>
    %44 = vector.multi_reduction <add>, %40, %cst_23 [0] : vector<64x128xf32> to vector<128xf32>
    %45 = vector.shape_cast %44 : vector<128xf32> to vector<1x128xf32>
    %46 = arith.mulf %40, %40 : vector<64x128xf32>
    %cst_24 = arith.constant dense<0.000000e+00> : vector<128xf32>
    %47 = vector.multi_reduction <add>, %46, %cst_24 [0] : vector<64x128xf32> to vector<128xf32>
    %48 = vector.shape_cast %47 : vector<128xf32> to vector<1x128xf32>
    %49 = tpu.concatenate %45, %48 in 0 : vector<1x128xf32>, vector<1x128xf32> -> vector<2x128xf32>
    %50 = vector.shape_cast %49 : vector<2x128xf32> to vector<1x2x128xf32>
    %c0_25 = arith.constant 0 : index
    %c0_26 = arith.constant 0 : index
    %c0_27 = arith.constant 0 : index
    %51 = vector.load %arg6[%c0_25, %c0_26, %c0_27] : memref<1x2x128xf32, #tpu.memory_space<vmem>>, vector<1x2x128xf32>
    tpu.vector_store %arg6[%c0_25, %c0_26, %c0_27], %50 {strides = array<i32>} : memref<1x2x128xf32, #tpu.memory_space<vmem>>, vector<1x2x128xf32>,
    return
  }
  func.func @transform_0(%arg0: i32) -> (i32, i32, i32, i32) {
    %c0_i32 = arith.constant 0 : i32
    %c0_i32_0 = arith.constant 0 : i32
    %c0_i32_1 = arith.constant 0 : i32
    %c0_i32_2 = arith.constant 0 : i32
    return %arg0, %c0_i32, %c0_i32_0, %c0_i32_1 : i32, i32, i32, i32
  }
  func.func @transform_1(%arg0: i32) -> (i32, i32) {
    %c0_i32 = arith.constant 0 : i32
    %c0_i32_0 = arith.constant 0 : i32
    %c0_i32_1 = arith.constant 0 : i32
    return %c0_i32, %c0_i32_0 : i32, i32
  }
  func.func @transform_2(%arg0: i32) -> (i32, i32) {
    %c0_i32 = arith.constant 0 : i32
    %c0_i32_0 = arith.constant 0 : i32
    %c0_i32_1 = arith.constant 0 : i32
    return %c0_i32, %c0_i32_0 : i32, i32
  }
  func.func @transform_3(%arg0: i32) -> (i32, i32, i32) {
    %c0_i32 = arith.constant 0 : i32
    %c0_i32_0 = arith.constant 0 : i32
    %c0_i32_1 = arith.constant 0 : i32
    %c0_i32_2 = arith.constant 0 : i32
    return %c0_i32, %c0_i32_0, %c0_i32_1 : i32, i32, i32
  }
  func.func @transform_4(%arg0: i32) -> (i32, i32, i32) {
    %c0_i32 = arith.constant 0 : i32
    %c0_i32_0 = arith.constant 0 : i32
    %c0_i32_1 = arith.constant 0 : i32
    return %arg0, %c0_i32, %c0_i32_0 : i32, i32, i32
  }
  func.func @transform_5(%arg0: i32) -> (i32, i32, i32) {
    %c0_i32 = arith.constant 0 : i32
    %c0_i32_0 = arith.constant 0 : i32
    %c0_i32_1 = arith.constant 0 : i32
    return %arg0, %c0_i32, %c0_i32_0 : i32, i32, i32
  }
}

module attributes {stable_mosaic.version = 11 : i64} {
  func.func @_bn_relu_matmul_kernel(%arg0: i32, %arg1: memref<128x128xbf16, #tpu.memory_space<vmem>>, %arg2: memref<1x128xf32, #tpu.memory_space<vmem>>, %arg3: memref<1x128xf32, #tpu.memory_space<vmem>>, %arg4: memref<128x128xbf16, #tpu.memory_space<vmem>>, %arg5: memref<128x128xbf16, #tpu.memory_space<vmem>>, %arg6: memref<1x2x128xf32, #tpu.memory_space<vmem>>) attributes {dimension_semantics = [#tpu.dimension_semantics<parallel>], iteration_bounds = array<i64: 1>, scalar_prefetch = 0 : i64, scratch_operands = 0 : i64, tpu.core_type = #tpu.core_type<tc>, window_params = [{transform_indices = @transform_0, window_bounds = array<i64: 128, 128>}, {pipeline_mode = #tpu.pipeline_mode<synchronous>, transform_indices = @transform_1, window_bounds = array<i64: 1, 128>}, {pipeline_mode = #tpu.pipeline_mode<synchronous>, transform_indices = @transform_2, window_bounds = array<i64: 1, 128>}, {pipeline_mode = #tpu.pipeline_mode<synchronous>, transform_indices = @transform_3, window_bounds = array<i64: 128, 128>}, {transform_indices = @transform_4, window_bounds = array<i64: 128, 128>}, {transform_indices = @transform_5, window_bounds = array<i64: 1, 2, 128>}]} {
    %c0 = arith.constant 0 : index
    %c0_0 = arith.constant 0 : index
    %0 = vector.load %arg1[%c0, %c0_0] : memref<128x128xbf16, #tpu.memory_space<vmem>>, vector<128x128xbf16>
    %1 = arith.extf %0 : vector<128x128xbf16> to vector<128x128xf32>
    %c0_1 = arith.constant 0 : index
    %c0_2 = arith.constant 0 : index
    %2 = vector.load %arg2[%c0_1, %c0_2] : memref<1x128xf32, #tpu.memory_space<vmem>>, vector<1x128xf32>
    %3 = vector.broadcast %2 : vector<1x128xf32> to vector<128x128xf32>
    %4 = arith.mulf %1, %3 : vector<128x128xf32>
    %c0_3 = arith.constant 0 : index
    %c0_4 = arith.constant 0 : index
    %5 = vector.load %arg3[%c0_3, %c0_4] : memref<1x128xf32, #tpu.memory_space<vmem>>, vector<1x128xf32>
    %6 = vector.broadcast %5 : vector<1x128xf32> to vector<128x128xf32>
    %7 = arith.addf %4, %6 : vector<128x128xf32>
    %cst = arith.constant 0.000000e+00 : f32
    %8 = vector.broadcast %cst : f32 to vector<128x128xf32>
    %9 = arith.maximumf %7, %8 : vector<128x128xf32>
    %10 = arith.truncf %9 : vector<128x128xf32> to vector<128x128xbf16>
    %c0_5 = arith.constant 0 : index
    %c0_6 = arith.constant 0 : index
    %11 = vector.load %arg4[%c0_5, %c0_6] : memref<128x128xbf16, #tpu.memory_space<vmem>>, vector<128x128xbf16>
    %cst_7 = arith.constant dense<0.000000e+00> : vector<128x128xf32>
    %12 = tpu.matmul %10, %11, %cst_7 {dimension_numbers = #tpu.dot_dimension_numbers<[1], [0], [0], [1], [0, 0, 1, 1], [], []>} : vector<128x128xbf16>, vector<128x128xbf16>, vector<128x128xf32> -> vector<128x128xf32>
    %13 = arith.truncf %12 : vector<128x128xf32> to vector<128x128xbf16>
    %c0_8 = arith.constant 0 : index
    %c0_9 = arith.constant 0 : index
    %14 = vector.load %arg5[%c0_8, %c0_9] : memref<128x128xbf16, #tpu.memory_space<vmem>>, vector<128x128xbf16>
    tpu.vector_store %arg5[%c0_8, %c0_9], %13 {strides = array<i32>} : memref<128x128xbf16, #tpu.memory_space<vmem>>, vector<128x128xbf16>,
    %cst_10 = arith.constant dense<0.000000e+00> : vector<128xf32>
    %15 = vector.multi_reduction <add>, %12, %cst_10 [0] : vector<128x128xf32> to vector<128xf32>
    %16 = vector.shape_cast %15 : vector<128xf32> to vector<1x128xf32>
    %17 = arith.mulf %12, %12 : vector<128x128xf32>
    %cst_11 = arith.constant dense<0.000000e+00> : vector<128xf32>
    %18 = vector.multi_reduction <add>, %17, %cst_11 [0] : vector<128x128xf32> to vector<128xf32>
    %19 = vector.shape_cast %18 : vector<128xf32> to vector<1x128xf32>
    %20 = tpu.concatenate %16, %19 in 0 : vector<1x128xf32>, vector<1x128xf32> -> vector<2x128xf32>
    %21 = vector.shape_cast %20 : vector<2x128xf32> to vector<1x2x128xf32>
    %c0_12 = arith.constant 0 : index
    %c0_13 = arith.constant 0 : index
    %c0_14 = arith.constant 0 : index
    %22 = vector.load %arg6[%c0_12, %c0_13, %c0_14] : memref<1x2x128xf32, #tpu.memory_space<vmem>>, vector<1x2x128xf32>
    tpu.vector_store %arg6[%c0_12, %c0_13, %c0_14], %21 {strides = array<i32>} : memref<1x2x128xf32, #tpu.memory_space<vmem>>, vector<1x2x128xf32>,
    return
  }
  func.func @transform_0(%arg0: i32) -> (i32, i32) {
    %c0_i32 = arith.constant 0 : i32
    %c0_i32_0 = arith.constant 0 : i32
    return %arg0, %c0_i32 : i32, i32
  }
  func.func @transform_1(%arg0: i32) -> (i32, i32) {
    %c0_i32 = arith.constant 0 : i32
    %c0_i32_0 = arith.constant 0 : i32
    %c0_i32_1 = arith.constant 0 : i32
    return %c0_i32, %c0_i32_0 : i32, i32
  }
  func.func @transform_2(%arg0: i32) -> (i32, i32) {
    %c0_i32 = arith.constant 0 : i32
    %c0_i32_0 = arith.constant 0 : i32
    %c0_i32_1 = arith.constant 0 : i32
    return %c0_i32, %c0_i32_0 : i32, i32
  }
  func.func @transform_3(%arg0: i32) -> (i32, i32) {
    %c0_i32 = arith.constant 0 : i32
    %c0_i32_0 = arith.constant 0 : i32
    %c0_i32_1 = arith.constant 0 : i32
    return %c0_i32, %c0_i32_0 : i32, i32
  }
  func.func @transform_4(%arg0: i32) -> (i32, i32) {
    %c0_i32 = arith.constant 0 : i32
    %c0_i32_0 = arith.constant 0 : i32
    return %arg0, %c0_i32 : i32, i32
  }
  func.func @transform_5(%arg0: i32) -> (i32, i32, i32) {
    %c0_i32 = arith.constant 0 : i32
    %c0_i32_0 = arith.constant 0 : i32
    %c0_i32_1 = arith.constant 0 : i32
    return %arg0, %c0_i32, %c0_i32_0 : i32, i32, i32
  }
}

module attributes {stable_mosaic.version = 11 : i64} {
  func.func @_final_ds_kernel(%arg0: i32, %arg1: memref<128x128xbf16, #tpu.memory_space<vmem>>, %arg2: memref<128x128xbf16, #tpu.memory_space<vmem>>, %arg3: memref<1x128xf32, #tpu.memory_space<vmem>>, %arg4: memref<1x128xf32, #tpu.memory_space<vmem>>, %arg5: memref<1x128xf32, #tpu.memory_space<vmem>>, %arg6: memref<1x128xf32, #tpu.memory_space<vmem>>, %arg7: memref<128x128xbf16, #tpu.memory_space<vmem>>) attributes {dimension_semantics = [#tpu.dimension_semantics<parallel>], iteration_bounds = array<i64: 1>, scalar_prefetch = 0 : i64, scratch_operands = 0 : i64, tpu.core_type = #tpu.core_type<tc>, window_params = [{transform_indices = @transform_0, window_bounds = array<i64: 128, 128>}, {transform_indices = @transform_1, window_bounds = array<i64: 128, 128>}, {pipeline_mode = #tpu.pipeline_mode<synchronous>, transform_indices = @transform_2, window_bounds = array<i64: 1, 128>}, {pipeline_mode = #tpu.pipeline_mode<synchronous>, transform_indices = @transform_3, window_bounds = array<i64: 1, 128>}, {pipeline_mode = #tpu.pipeline_mode<synchronous>, transform_indices = @transform_4, window_bounds = array<i64: 1, 128>}, {pipeline_mode = #tpu.pipeline_mode<synchronous>, transform_indices = @transform_5, window_bounds = array<i64: 1, 128>}, {transform_indices = @transform_6, window_bounds = array<i64: 128, 128>}]} {
    %c0 = arith.constant 0 : index
    %c0_0 = arith.constant 0 : index
    %0 = vector.load %arg1[%c0, %c0_0] : memref<128x128xbf16, #tpu.memory_space<vmem>>, vector<128x128xbf16>
    %1 = arith.extf %0 : vector<128x128xbf16> to vector<128x128xf32>
    %c0_1 = arith.constant 0 : index
    %c0_2 = arith.constant 0 : index
    %2 = vector.load %arg3[%c0_1, %c0_2] : memref<1x128xf32, #tpu.memory_space<vmem>>, vector<1x128xf32>
    %3 = vector.broadcast %2 : vector<1x128xf32> to vector<128x128xf32>
    %4 = arith.mulf %1, %3 : vector<128x128xf32>
    %c0_3 = arith.constant 0 : index
    %c0_4 = arith.constant 0 : index
    %5 = vector.load %arg4[%c0_3, %c0_4] : memref<1x128xf32, #tpu.memory_space<vmem>>, vector<1x128xf32>
    %6 = vector.broadcast %5 : vector<1x128xf32> to vector<128x128xf32>
    %7 = arith.addf %4, %6 : vector<128x128xf32>
    %c0_5 = arith.constant 0 : index
    %c0_6 = arith.constant 0 : index
    %8 = vector.load %arg2[%c0_5, %c0_6] : memref<128x128xbf16, #tpu.memory_space<vmem>>, vector<128x128xbf16>
    %9 = arith.extf %8 : vector<128x128xbf16> to vector<128x128xf32>
    %c0_7 = arith.constant 0 : index
    %c0_8 = arith.constant 0 : index
    %10 = vector.load %arg5[%c0_7, %c0_8] : memref<1x128xf32, #tpu.memory_space<vmem>>, vector<1x128xf32>
    %11 = vector.broadcast %10 : vector<1x128xf32> to vector<128x128xf32>
    %12 = arith.mulf %9, %11 : vector<128x128xf32>
    %c0_9 = arith.constant 0 : index
    %c0_10 = arith.constant 0 : index
    %13 = vector.load %arg6[%c0_9, %c0_10] : memref<1x128xf32, #tpu.memory_space<vmem>>, vector<1x128xf32>
    %14 = vector.broadcast %13 : vector<1x128xf32> to vector<128x128xf32>
    %15 = arith.addf %12, %14 : vector<128x128xf32>
    %16 = arith.addf %7, %15 : vector<128x128xf32>
    %cst = arith.constant 0.000000e+00 : f32
    %17 = vector.broadcast %cst : f32 to vector<128x128xf32>
    %18 = arith.maximumf %16, %17 : vector<128x128xf32>
    %19 = arith.truncf %18 : vector<128x128xf32> to vector<128x128xbf16>
    %c0_11 = arith.constant 0 : index
    %c0_12 = arith.constant 0 : index
    %20 = vector.load %arg7[%c0_11, %c0_12] : memref<128x128xbf16, #tpu.memory_space<vmem>>, vector<128x128xbf16>
    tpu.vector_store %arg7[%c0_11, %c0_12], %19 {strides = array<i32>} : memref<128x128xbf16, #tpu.memory_space<vmem>>, vector<128x128xbf16>,
    return
  }
  func.func @transform_0(%arg0: i32) -> (i32, i32) {
    %c0_i32 = arith.constant 0 : i32
    %c0_i32_0 = arith.constant 0 : i32
    return %arg0, %c0_i32 : i32, i32
  }
  func.func @transform_1(%arg0: i32) -> (i32, i32) {
    %c0_i32 = arith.constant 0 : i32
    %c0_i32_0 = arith.constant 0 : i32
    return %arg0, %c0_i32 : i32, i32
  }
  func.func @transform_2(%arg0: i32) -> (i32, i32) {
    %c0_i32 = arith.constant 0 : i32
    %c0_i32_0 = arith.constant 0 : i32
    %c0_i32_1 = arith.constant 0 : i32
    return %c0_i32, %c0_i32_0 : i32, i32
  }
  func.func @transform_3(%arg0: i32) -> (i32, i32) {
    %c0_i32 = arith.constant 0 : i32
    %c0_i32_0 = arith.constant 0 : i32
    %c0_i32_1 = arith.constant 0 : i32
    return %c0_i32, %c0_i32_0 : i32, i32
  }
  func.func @transform_4(%arg0: i32) -> (i32, i32) {
    %c0_i32 = arith.constant 0 : i32
    %c0_i32_0 = arith.constant 0 : i32
    %c0_i32_1 = arith.constant 0 : i32
    return %c0_i32, %c0_i32_0 : i32, i32
  }
  func.func @transform_5(%arg0: i32) -> (i32, i32) {
    %c0_i32 = arith.constant 0 : i32
    %c0_i32_0 = arith.constant 0 : i32
    %c0_i32_1 = arith.constant 0 : i32
    return %c0_i32, %c0_i32_0 : i32, i32
  }
  func.func @transform_6(%arg0: i32) -> (i32, i32) {
    %c0_i32 = arith.constant 0 : i32
    %c0_i32_0 = arith.constant 0 : i32
    return %arg0, %c0_i32 : i32, i32
  }
}

</mosaic_0001>

<bundles_post_ra>
// kernel: bottleneck_forward.7
= control target key start
LH: loop header
LB: loop body
LE: loop exit
PB: predicated region body
PF: predicated region fallthrough
CT: control target
= control target key end

     0   :  { %s647_s0 = inlined_call_operand.vmem [shape: bf16[128,128], index: 0, kind: input, shape index: {}]   ;;  %s648_s1 = inlined_call_operand.vmem [shape: bf16[128,128], index: 1, kind: input, shape index: {}]   ;;  %s649_s2 = inlined_call_operand.vmem [shape: f32[1,128], index: 2, kind: input, shape index: {}]   ;;  %s650_s3 = inlined_call_operand.vmem [shape: f32[1,128], index: 3, kind: input, shape index: {}]   ;;  %s651_s4 = inlined_call_operand.vmem [shape: f32[1,128], index: 4, kind: input, shape index: {}]   ;;  %s652_s5 = inlined_call_operand.vmem [shape: f32[1,128], index: 5, kind: input, shape index: {}]   ;;  %s653_s6 = inlined_call_operand.vmem [shape: bf16[128,128], index: 6, kind: output, shape index: {}]  }
   0x1   :  { %v332_v0 = vld [vmem:[%s647_s0] sm:$0xff]   ;;  %v435_v9 = vld [vmem:[%s647_s0 + $0x8] sm:$0xff]   ;;  %v436_v20 = vld [vmem:[%s647_s0 + $0x10] sm:$0xff]  }
   0x2   :  { %v497_v1 = vld [vmem:[%s649_s2] ss:$0 sm:$0xff]  ;;  %v333_v2 = vunpack.c.l.bf16 %v332_v0  ;;  %v334_v3 = vunpack.c.h.bf16 %v332_v0  ;;  %v442_v10 = vld [vmem:[%s648_s1 + $0x8] sm:$0xff]   ;;  %v337_v14 = vunpack.c.l.bf16 %v435_v9  ;;  %v338_v15 = vunpack.c.h.bf16 %v435_v9  ;;  %v443_v29 = vld [vmem:[%s648_s1 + $0x10] sm:$0xff]  }
   0x3   :  { %v364_v4 = vld [vmem:[%s648_s1] sm:$0xff]   ;;  %v369_v18 = vunpack.c.l.bf16 %v442_v10  ;;  %v370_v19 = vunpack.c.h.bf16 %v442_v10  ;;  %v341_v32 = vunpack.c.l.bf16 %v436_v20  ;;  %v342_v33 = vunpack.c.h.bf16 %v436_v20  ;;  %v437_v42 = vld [vmem:[%s647_s0 + $0x18] sm:$0xff]  }
   0x4   :  { %v505_v5 = vld [vmem:[%s651_s4] ss:$0 sm:$0xff]  ;;  %v365_v7 = vunpack.c.l.bf16 %v364_v4  ;;  %v366_v8 = vunpack.c.h.bf16 %v364_v4  ;;  %v62_v11 = vmul.f32 %v333_v2, %v497_v1  ;;  %v63_v12 = vmul.f32 %v334_v3, %v497_v1  ;;  %v444_v47 = vld [vmem:[%s648_s1 + $0x18] sm:$0xff]  }
   0x5   :  { %v510_v6 = vld [vmem:[%s650_s3] ss:$0 sm:$0xff]  ;;  %v64_v23 = vmul.f32 %v337_v14, %v497_v1  ;;  %v65_v24 = vmul.f32 %v338_v15, %v497_v1  ;;  %v142_v27 = vmul.f32 %v369_v18, %v505_v5  ;;  %v143_v28 = vmul.f32 %v370_v19, %v505_v5  ;;  %v439_v14 = vld [vmem:[%s647_s0 + $0x28] sm:$0xff]  }
   0x6   :  { %v523_v13 = vld [vmem:[%s652_s5] ss:$0 sm:$0xff]  ;;  %v140_v16 = vmul.f32 %v365_v7, %v505_v5  ;;  %v141_v17 = vmul.f32 %v366_v8, %v505_v5  ;;  %v85_v21 = vadd.f32 %v510_v6, %v62_v11  ;;  %v86_v22 = vadd.f32 %v510_v6, %v63_v12 }
   0x7   :  { %v87_v30 = vadd.f32 %v510_v6, %v64_v23  ;;  %v88_v31 = vadd.f32 %v510_v6, %v65_v24  ;;  %v165_v36 = vadd.f32 %v523_v13, %v142_v27  ;;  %v166_v37 = vadd.f32 %v523_v13, %v143_v28  ;;  %v438_v52 = vld [vmem:[%s647_s0 + $0x20] sm:$0xff]   ;;  %v446_v23 = vld [vmem:[%s648_s1 + $0x28] sm:$0xff]  }
   0x8   :  { %v163_v25 = vadd.f32 %v523_v13, %v140_v16  ;;  %v164_v26 = vadd.f32 %v523_v13, %v141_v17  ;;  %v66_v38 = vmul.f32 %v341_v32, %v497_v1  ;;  %v67_v39 = vmul.f32 %v342_v33, %v497_v1  ;;  %v445_v8 = vld [vmem:[%s648_s1 + $0x20] sm:$0xff]   ;;  %v440_v32 = vld [vmem:[%s647_s0 + $0x30] sm:$0xff]  }
   0x9   :  { %v373_v40 = vunpack.c.l.bf16 %v443_v29  ;;  %v374_v41 = vunpack.c.h.bf16 %v443_v29  ;;  %v181_v45 = vadd.f32 %v165_v36, %v87_v30  ;;  %v182_v46 = vadd.f32 %v166_v37, %v88_v31 }
   0xa   :  { %v179_v34 = vadd.f32 %v163_v25, %v85_v21  ;;  %v180_v35 = vadd.f32 %v164_v26, %v86_v22  ;;  %v89_v48 = vadd.f32 %v510_v6, %v66_v38  ;;  %v90_v49 = vadd.f32 %v510_v6, %v67_v39 }
   0xb   :  { %v144_v50 = vmul.f32 %v373_v40, %v505_v5  ;;  %v145_v51 = vmul.f32 %v374_v41, %v505_v5  ;;  %v197_v54 = vmax.f32 %v181_v45, 0.0  ;;  %v198_v55 = vmax.f32 %v182_v46, 0.0  ;;  %v447_v45 = vld [vmem:[%s648_s1 + $0x30] sm:$0xff]  }
   0xc   :  { %v195_v43 = vmax.f32 %v179_v34, 0.0  ;;  %v196_v44 = vmax.f32 %v180_v35, 0.0  ;;  %v345_v56 = vunpack.c.l.bf16 %v437_v42  ;;  %v346_v59 = vunpack.c.h.bf16 %v437_v42 }
   0xd   :  { %v167_v57 = vadd.f32 %v523_v13, %v144_v50  ;;  %v168_v58 = vadd.f32 %v523_v13, %v145_v51  ;;  %v377_v60 = vunpack.c.l.bf16 %v444_v47  ;;  %v403_v61 = vpack.c.bf16 %v198_v55, %v197_v54  ;;  %v441_v54 = vld [vmem:[%s647_s0 + $0x38] sm:$0xff]  }
   0xe   :  { %v398_v53 = vpack.c.bf16 %v196_v44, %v195_v43  ;;  %v68_v62 = vmul.f32 %v345_v56, %v497_v1  ;;  %v378_v63 = vunpack.c.h.bf16 %v444_v47  ;;  %v349_v0 = vunpack.c.l.bf16 %v438_v52 }
   0xf   :  { %v183_v2 = vadd.f32 %v167_v57, %v89_v48  ;;  %v184_v3 = vadd.f32 %v168_v58, %v90_v49  ;;  %v69_v4 = vmul.f32 %v346_v59, %v497_v1  ;;  %v146_v7 = vmul.f32 %v377_v60, %v505_v5  ;;  %449 = vst [vmem:[%s653_s6 + $0x8] sm:$0xff] %v403_v61  }
  0x10   :  { %399 = vst [vmem:[%s653_s6] sm:$0xff] %v398_v53   ;;  %v91_v9 = vadd.f32 %v510_v6, %v68_v62  ;;  %v147_v10 = vmul.f32 %v378_v63, %v505_v5  ;;  %v350_v11 = vunpack.c.h.bf16 %v438_v52  ;;  %v70_v12 = vmul.f32 %v349_v0, %v497_v1 }
  0x11   :  { %v199_v15 = vmax.f32 %v183_v2, 0.0  ;;  %v200_v16 = vmax.f32 %v184_v3, 0.0  ;;  %v92_v17 = vadd.f32 %v510_v6, %v69_v4  ;;  %v169_v18 = vadd.f32 %v523_v13, %v146_v7  ;;  %v448_v4 = vld [vmem:[%s648_s1 + $0x38] sm:$0xff]  }
  0x12   :  { %v170_v19 = vadd.f32 %v523_v13, %v147_v10  ;;  %v71_v20 = vmul.f32 %v350_v11, %v497_v1  ;;  %v93_v21 = vadd.f32 %v510_v6, %v70_v12  ;;  %v381_v22 = vunpack.c.l.bf16 %v445_v8 }
  0x13   :  { %v408_v24 = vpack.c.bf16 %v200_v16, %v199_v15  ;;  %v185_v25 = vadd.f32 %v169_v18, %v91_v9  ;;  %v382_v26 = vunpack.c.h.bf16 %v445_v8  ;;  %v353_v27 = vunpack.c.l.bf16 %v439_v14 }
  0x14   :  { %v186_v28 = vadd.f32 %v170_v19, %v92_v17  ;;  %v94_v29 = vadd.f32 %v510_v6, %v71_v20  ;;  %v148_v30 = vmul.f32 %v381_v22, %v505_v5  ;;  %v354_v31 = vunpack.c.h.bf16 %v439_v14 }
  0x15   :  { %450 = vst [vmem:[%s653_s6 + $0x10] sm:$0xff] %v408_v24   ;;  %v201_v33 = vmax.f32 %v185_v25, 0.0  ;;  %v149_v34 = vmul.f32 %v382_v26, %v505_v5  ;;  %v72_v35 = vmul.f32 %v353_v27, %v497_v1  ;;  %v385_v36 = vunpack.c.l.bf16 %v446_v23 }
  0x16   :  { %v202_v37 = vmax.f32 %v186_v28, 0.0  ;;  %v171_v38 = vadd.f32 %v523_v13, %v148_v30  ;;  %v73_v39 = vmul.f32 %v354_v31, %v497_v1  ;;  %v386_v40 = vunpack.c.h.bf16 %v446_v23 }
  0x17   :  { %v172_v41 = vadd.f32 %v523_v13, %v149_v34  ;;  %v95_v42 = vadd.f32 %v510_v6, %v72_v35  ;;  %v150_v43 = vmul.f32 %v385_v36, %v505_v5  ;;  %v357_v44 = vunpack.c.l.bf16 %v440_v32 }
  0x18   :  { %v413_v46 = vpack.c.bf16 %v202_v37, %v201_v33  ;;  %v187_v47 = vadd.f32 %v171_v38, %v93_v21  ;;  %v96_v48 = vadd.f32 %v510_v6, %v73_v39  ;;  %v151_v49 = vmul.f32 %v386_v40, %v505_v5 }
  0x19   :  { %v188_v50 = vadd.f32 %v172_v41, %v94_v29  ;;  %v173_v51 = vadd.f32 %v523_v13, %v150_v43  ;;  %v358_v52 = vunpack.c.h.bf16 %v440_v32  ;;  %v74_v53 = vmul.f32 %v357_v44, %v497_v1 }
  0x1a   :  { %451 = vst [vmem:[%s653_s6 + $0x18] sm:$0xff] %v413_v46   ;;  %v203_v55 = vmax.f32 %v187_v47, 0.0  ;;  %v174_v56 = vadd.f32 %v523_v13, %v151_v49  ;;  %v389_v57 = vunpack.c.l.bf16 %v447_v45  ;;  %v390_v58 = vunpack.c.h.bf16 %v447_v45 }
  0x1b   :  { %v204_v59 = vmax.f32 %v188_v50, 0.0  ;;  %v189_v60 = vadd.f32 %v173_v51, %v95_v42  ;;  %v75_v61 = vmul.f32 %v358_v52, %v497_v1  ;;  %v97_v62 = vadd.f32 %v510_v6, %v74_v53 }
  0x1c   :  { %v190_v63 = vadd.f32 %v174_v56, %v96_v48  ;;  %v152_v0 = vmul.f32 %v389_v57, %v505_v5  ;;  %v153_v2 = vmul.f32 %v390_v58, %v505_v5  ;;  %v361_v3 = vunpack.c.l.bf16 %v441_v54 }
  0x1d   :  { %v418_v7 = vpack.c.bf16 %v204_v59, %v203_v55  ;;  %v205_v8 = vmax.f32 %v189_v60, 0.0  ;;  %v98_v9 = vadd.f32 %v510_v6, %v75_v61  ;;  %v362_v10 = vunpack.c.h.bf16 %v441_v54 }
  0x1e   :  { %v206_v11 = vmax.f32 %v190_v63, 0.0  ;;  %v175_v12 = vadd.f32 %v523_v13, %v152_v0  ;;  %v176_v14 = vadd.f32 %v523_v13, %v153_v2  ;;  %v76_v15 = vmul.f32 %v361_v3, %v497_v1 }
  0x1f   :  { %452 = vst [vmem:[%s653_s6 + $0x20] sm:$0xff] %v418_v7   ;;  %v77_v16 = vmul.f32 %v362_v10, %v497_v1  ;;  %v393_v17 = vunpack.c.l.bf16 %v448_v4  ;;  %v394_v18 = vunpack.c.h.bf16 %v448_v4 }
  0x20   :  { %v423_v19 = vpack.c.bf16 %v206_v11, %v205_v8  ;;  %v191_v20 = vadd.f32 %v175_v12, %v97_v62  ;;  %v192_v21 = vadd.f32 %v176_v14, %v98_v9  ;;  %v99_v22 = vadd.f32 %v510_v6, %v76_v15 }
  0x21   :  { %v100_v23 = vadd.f32 %v510_v6, %v77_v16  ;;  %v154_v24 = vmul.f32 %v393_v17, %v505_v5  ;;  %v155_v25 = vmul.f32 %v394_v18, %v505_v5 }
  0x22   :  { %453 = vst [vmem:[%s653_s6 + $0x28] sm:$0xff] %v423_v19   ;;  %v207_v26 = vmax.f32 %v191_v20, 0.0  ;;  %v208_v27 = vmax.f32 %v192_v21, 0.0 }
  0x23   :  { %v177_v1 = vadd.f32 %v523_v13, %v154_v24  ;;  %v178_v28 = vadd.f32 %v523_v13, %v155_v25 }
  0x24   :  { %v428_v29 = vpack.c.bf16 %v208_v27, %v207_v26 }
  0x25   :  { %v193_v30 = vadd.f32 %v177_v1, %v99_v22  ;;  %v194_v31 = vadd.f32 %v178_v28, %v100_v23 }
  0x26   :  { %454 = vst [vmem:[%s653_s6 + $0x30] sm:$0xff] %v428_v29  }
  0x27   :  { %v209_v6 = vmax.f32 %v193_v30, 0.0  ;;  %v210_v32 = vmax.f32 %v194_v31, 0.0 }
  0x29   :  { %v433_v5 = vpack.c.bf16 %v210_v32, %v209_v6 }
  0x2b   :  { %455 = vst [vmem:[%s653_s6 + $0x38] sm:$0xff] %v433_v5  }

// kernel: bottleneck_forward.6
= control target key start
LH: loop header
LB: loop body
LE: loop exit
PB: predicated region body
PF: predicated region fallthrough
CT: control target
= control target key end

     0   :  { %vm421_vm0 = vcmask 1040384   ;;  %s779_s3 = inlined_call_operand.vmem [shape: bf16[128,128], index: 3, kind: input, shape index: {}]   ;;  %s780_s0 = inlined_call_operand.vmem [shape: bf16[128,128], index: 0, kind: input, shape index: {}]   ;;  %s781_s1 = inlined_call_operand.vmem [shape: f32[1,128], index: 1, kind: input, shape index: {}]   ;;  %s782_s2 = inlined_call_operand.vmem [shape: f32[1,128], index: 2, kind: input, shape index: {}]   ;;  %s783_s4 = inlined_call_operand.vmem [shape: bf16[128,128], index: 4, kind: output, shape index: {0}]   ;;  %s784_s5 = inlined_call_operand.vmem [shape: f32[1,2,128], index: 5, kind: output, shape index: {1}]  }
   0x1   :  { %v624_v0 = vld [vmem:[%s779_s3] sm:$0xff]   ;;  %v625_v1 = vld [vmem:[%s779_s3 + $0x8] sm:$0xff]   ;;  %v626_v2 = vld [vmem:[%s779_s3 + $0x10] sm:$0xff]  }
   0x2   :  { %576 = vmatprep.subr.bf16.mxu0 %v624_v0  ;;  %608 = vmatprep.subr.bf16.mxu1 %v624_v0  ;;  %v627_v3 = vld [vmem:[%s779_s3 + $0x18] sm:$0xff]   ;;  %v475_v4 = vld [vmem:[%s780_s0] sm:$0xff]   ;;  %v546_v8 = vld [vmem:[%s780_s0 + $0x8] sm:$0xff]  }
   0x3   :  { %577 = vmatpush3.bf16.msra.mxu0 %v624_v0  ;;  %616 = vmatpush3.bf16.msra.mxu1 %v624_v0  ;;  %v680_v5 = vld [vmem:[%s781_s1] ss:$0 sm:$0xff]  ;;  %v476_v6 = vunpack.c.l.bf16 %v475_v4  ;;  %v477_v7 = vunpack.c.h.bf16 %v475_v4  ;;  %v547_v9 = vld [vmem:[%s780_s0 + $0x10] sm:$0xff]   ;;  %v480_v11 = vunpack.c.l.bf16 %v546_v8  ;;  %v481_v14 = vunpack.c.h.bf16 %v546_v8  ;;  %v548_v22 = vld [vmem:[%s780_s0 + $0x18] sm:$0xff]  }
   0x4   :  { %578 = vmatprep.subr.bf16.mxu0 %v625_v1  ;;  %609 = vmatprep.subr.bf16.mxu1 %v625_v1  ;;  %v691_v10 = vld [vmem:[%s782_s2] ss:$0 sm:$0xff]  ;;  %v484_v17 = vunpack.c.l.bf16 %v547_v9  ;;  %v485_v21 = vunpack.c.h.bf16 %v547_v9  ;;  %v550_v27 = vld [vmem:[%s780_s0 + $0x28] sm:$0xff]   ;;  %v551_v30 = vld [vmem:[%s780_s0 + $0x30] sm:$0xff]   ;;  %v488_v32 = vunpack.c.l.bf16 %v548_v22  ;;  %v489_v33 = vunpack.c.h.bf16 %v548_v22 }
   0x5   :  { %v59_v12 = vmul.f32 %v476_v6, %v680_v5  ;;  %v60_v13 = vmul.f32 %v477_v7, %v680_v5  ;;  %v549_v15 = vld [vmem:[%s780_s0 + $0x20] sm:$0xff]   ;;  %v61_v20 = vmul.f32 %v480_v11, %v680_v5  ;;  %v62_v26 = vmul.f32 %v481_v14, %v680_v5  ;;  %v629_v28 = vld [vmem:[%s779_s3 + $0x28] sm:$0xff]   ;;  %v552_v39 = vld [vmem:[%s780_s0 + $0x38] sm:$0xff]  }
   0x6   :  { %v628_v16 = vld [vmem:[%s779_s3 + $0x20] sm:$0xff]   ;;  %v492_v23 = vunpack.c.l.bf16 %v549_v15  ;;  %v63_v29 = vmul.f32 %v484_v17, %v680_v5  ;;  %v493_v34 = vunpack.c.h.bf16 %v549_v15  ;;  %v64_v36 = vmul.f32 %v485_v21, %v680_v5  ;;  %v630_v44 = vld [vmem:[%s779_s3 + $0x30] sm:$0xff]   ;;  %v631_v61 = vld [vmem:[%s779_s3 + $0x38] sm:$0xff]  }
   0x7   :  { %579 = vmatpush3.bf16.msra.mxu0 %v625_v1  ;;  %617 = vmatpush3.bf16.msra.mxu1 %v625_v1  ;;  %v82_v18 = vadd.f32 %v691_v10, %v59_v12  ;;  %v83_v19 = vadd.f32 %v691_v10, %v60_v13  ;;  %v84_v35 = vadd.f32 %v691_v10, %v61_v20  ;;  %v496_v38 = vunpack.c.l.bf16 %v550_v27 }
   0x8   :  { %580 = vmatprep.subr.bf16.mxu0 %v626_v2  ;;  %610 = vmatprep.subr.bf16.mxu1 %v626_v2  ;;  %v67_v37 = vmul.f32 %v492_v23, %v680_v5  ;;  %v85_v40 = vadd.f32 %v691_v10, %v62_v26  ;;  %v68_v41 = vmul.f32 %v493_v34, %v680_v5  ;;  %v497_v42 = vunpack.c.h.bf16 %v550_v27 }
   0x9   :  { %v98_v24 = vmax.f32 %v82_v18, 0.0  ;;  %v99_v25 = vmax.f32 %v83_v19, 0.0  ;;  %v500_v43 = vunpack.c.l.bf16 %v551_v30  ;;  %v86_v45 = vadd.f32 %v691_v10, %v63_v29 }
   0xa   :  { %v90_v46 = vadd.f32 %v691_v10, %v67_v37  ;;  %v69_v47 = vmul.f32 %v496_v38, %v680_v5  ;;  %v501_v48 = vunpack.c.h.bf16 %v551_v30  ;;  %v91_v49 = vadd.f32 %v691_v10, %v68_v41 }
   0xb   :  { %581 = vmatpush3.bf16.msra.mxu0 %v626_v2  ;;  %618 = vmatpush3.bf16.msra.mxu1 %v626_v2  ;;  %v114_v31 = vpack.c.bf16 %v99_v25, %v98_v24  ;;  %v70_v50 = vmul.f32 %v497_v42, %v680_v5  ;;  %v71_v51 = vmul.f32 %v500_v43, %v680_v5  ;;  %v504_v52 = vunpack.c.l.bf16 %v552_v39 }
   0xc   :  { %582 = vmatprep.subr.bf16.mxu0 %v627_v3  ;;  %611 = vmatprep.subr.bf16.mxu1 %v627_v3  ;;  %v106_v53 = vmax.f32 %v90_v46, 0.0  ;;  %v92_v54 = vadd.f32 %v691_v10, %v69_v47  ;;  %v72_v55 = vmul.f32 %v501_v48, %v680_v5  ;;  %v505_v56 = vunpack.c.h.bf16 %v552_v39 }
   0xd   :  { %592 = vmatprep.mubr.bf16.mxu0 %v114_v31  ;;  %v87_v57 = vadd.f32 %v691_v10, %v64_v36  ;;  %v107_v58 = vmax.f32 %v91_v49, 0.0  ;;  %v93_v59 = vadd.f32 %v691_v10, %v70_v50  ;;  %v94_v60 = vadd.f32 %v691_v10, %v71_v51 }
   0xe   :  { %v65_v62 = vmul.f32 %v488_v32, %v680_v5  ;;  %v95_v63 = vadd.f32 %v691_v10, %v72_v55  ;;  %v100_v0 = vmax.f32 %v84_v35, 0.0  ;;  %v101_v1 = vmax.f32 %v85_v40, 0.0 }
   0xf   :  { %583 = vmatpush3.bf16.msra.mxu0 %v627_v3  ;;  %619 = vmatpush3.bf16.msra.mxu1 %v627_v3  ;;  %v66_v2 = vmul.f32 %v489_v33, %v680_v5  ;;  %v118_v3 = vpack.c.bf16 %v107_v58, %v106_v53  ;;  %v108_v4 = vmax.f32 %v92_v54, 0.0  ;;  %v109_v6 = vmax.f32 %v93_v59, 0.0 }
  0x10   :  { %584 = vmatprep.subr.bf16.mxu0 %v628_v16  ;;  %612 = vmatprep.subr.bf16.mxu1 %v628_v16  ;;  %v73_v7 = vmul.f32 %v504_v52, %v680_v5  ;;  %v74_v8 = vmul.f32 %v505_v56, %v680_v5  ;;  %v102_v9 = vmax.f32 %v86_v45, 0.0  ;;  %v103_v11 = vmax.f32 %v87_v57, 0.0 }
  0x11   :  { %v110_v12 = vmax.f32 %v94_v60, 0.0  ;;  %v111_v13 = vmax.f32 %v95_v63, 0.0  ;;  %v88_v14 = vadd.f32 %v691_v10, %v65_v62  ;;  %v89_v15 = vadd.f32 %v691_v10, %v66_v2  ;;  %600 = vmatprep.mubr.bf16.mxu1 %v118_v3 }
  0x12   :  { %v119_v17 = vpack.c.bf16 %v109_v6, %v108_v4  ;;  %v96_v18 = vadd.f32 %v691_v10, %v73_v7  ;;  %v97_v19 = vadd.f32 %v691_v10, %v74_v8  ;;  %v116_v5 = vpack.c.bf16 %v103_v11, %v102_v9 }
  0x13   :  { %585 = vmatpush3.bf16.msra.mxu0 %v628_v16  ;;  %620 = vmatpush3.bf16.msra.mxu1 %v628_v16  ;;  %v115_v16 = vpack.c.bf16 %v101_v1, %v100_v0  ;;  %v120_v20 = vpack.c.bf16 %v111_v13, %v110_v12  ;;  %v104_v21 = vmax.f32 %v88_v14, 0.0  ;;  %v105_v22 = vmax.f32 %v89_v15, 0.0 }
  0x14   :  { %586 = vmatprep.subr.bf16.mxu0 %v629_v28  ;;  %613 = vmatprep.subr.bf16.mxu1 %v629_v28  ;;  %v112_v23 = vmax.f32 %v96_v18, 0.0  ;;  %v113_v24 = vmax.f32 %v97_v19, 0.0 }
  0x15   :  { %v117_v25 = vpack.c.bf16 %v105_v22, %v104_v21 }
  0x16   :  { %v121_v26 = vpack.c.bf16 %v113_v24, %v112_v23 }
  0x17   :  { %587 = vmatpush3.bf16.msra.mxu0 %v629_v28  ;;  %621 = vmatpush3.bf16.msra.mxu1 %v629_v28 }
  0x18   :  { %588 = vmatprep.subr.bf16.mxu0 %v630_v44  ;;  %614 = vmatprep.subr.bf16.mxu1 %v630_v44 }
  0x1b   :  { %589 = vmatpush3.bf16.msra.mxu0 %v630_v44  ;;  %622 = vmatpush3.bf16.msra.mxu1 %v630_v44 }
  0x1c   :  { %590 = vmatprep.subr.bf16.mxu0 %v631_v61  ;;  %615 = vmatprep.subr.bf16.mxu1 %v631_v61 }
  0x1f   :  { %591 = vmatpush3.bf16.msra.mxu0 %v631_v61  ;;  %623 = vmatpush3.bf16.msra.mxu1 %v631_v61 }
  0x22   :  { %593 = vmatmul.mubr.bf16.vlgmr.msra.gmra.mrb[0].mxu0 %v115_v16  ;;  %601 = vmatmul.mubr.bf16.vlgmr.msra.gmra.mrb[0].mxu1 %v119_v17 }
  0x23   :  { %596 = vmatprep.mubr.bf16.mxu0 %v116_v5  ;;  %604 = vmatprep.mubr.bf16.mxu1 %v120_v20 }
  0x2a   :  { %597 = vmatmul.mubr.bf16.gmra.mrb[4].mxu0 %v117_v25  ;;  %605 = vmatmul.mubr.bf16.gmra.mrb[4].mxu1 %v121_v26 }
  0xf5   :  { %v594_v27 = vpop.f32.mrb[0].mxu0  ;;  %v602_v28 = vpop.f32.mrb[0].mxu1 }
  0xf6   :  { %v220_v29 = vpop.f32.mrb[1].mxu0  ;;  %v252_v10 = vpop.f32.mrb[1].mxu1  ;;  %v386_v41 = vmul.f32 %v594_v27, %v594_v27  ;;  %v394_v15 = vmul.f32 %v602_v28, %v602_v28 }
  0xf7   :  { %v595_v30 = vpop.f32.mrb[2].mxu0  ;;  %v603_v31 = vpop.f32.mrb[2].mxu1  ;;  %v384_v32 = vmul.f32 %v220_v29, %v220_v29  ;;  %v392_v8 = vmul.f32 %v252_v10, %v252_v10 }
  0xf8   :  { %v514_v33 = vpack.c.bf16 %v595_v30, %v594_v27  ;;  %v223_v34 = vpop.f32.mrb[3].mxu0  ;;  %v534_v35 = vpack.c.bf16 %v603_v31, %v602_v28  ;;  %v255_v36 = vpop.f32.mrb[3].mxu1  ;;  %v387_v44 = vmul.f32 %v595_v30, %v595_v30  ;;  %v395_v18 = vmul.f32 %v603_v31, %v603_v31 }
  0xf9   :  { %v509_v37 = vpack.c.bf16 %v223_v34, %v220_v29  ;;  %v363_v38 = vadd.f32 %v223_v34, %v220_v29  ;;  %v385_v39 = vmul.f32 %v223_v34, %v223_v34  ;;  %v529_v40 = vpack.c.bf16 %v255_v36, %v252_v10 }
  0xfa   :  { %553 = vst [vmem:[%s783_s4 + $0x8] sm:$0xff] %v514_v33   ;;  %557 = vst [vmem:[%s783_s4 + $0x28] sm:$0xff] %v534_v35   ;;  %v393_v14 = vmul.f32 %v255_v36, %v255_v36 }
  0xfb   :  { %510 = vst [vmem:[%s783_s4] sm:$0xff] %v509_v37   ;;  %v364_v42 = vadd.f32 %v594_v27, %v363_v38  ;;  %v400_v43 = vadd.f32 %v385_v39, %v384_v32  ;;  %556 = vst [vmem:[%s783_s4 + $0x20] sm:$0xff] %v529_v40  }
  0xfd   :  { %v401_v45 = vadd.f32 %v400_v43, %v386_v41  ;;  %v598_v46 = vpop.f32.mrb[4].mxu0  ;;  %v365_v47 = vadd.f32 %v595_v30, %v364_v42  ;;  %v606_v48 = vpop.f32.mrb[4].mxu1 }
  0xfe   :  { %v236_v49 = vpop.f32.mrb[5].mxu0  ;;  %v268_v50 = vpop.f32.mrb[5].mxu1  ;;  %v390_v1 = vmul.f32 %v598_v46, %v598_v46  ;;  %v398_v26 = vmul.f32 %v606_v48, %v606_v48 }
  0xff   :  { %v366_v51 = vadd.f32 %v365_v47, %v236_v49  ;;  %v388_v52 = vmul.f32 %v236_v49, %v236_v49  ;;  %v402_v53 = vadd.f32 %v401_v45, %v387_v44  ;;  %v599_v54 = vpop.f32.mrb[6].mxu0  ;;  %v607_v55 = vpop.f32.mrb[6].mxu1  ;;  %v396_v20 = vmul.f32 %v268_v50, %v268_v50 }
 0x100   :  { %v524_v56 = vpack.c.bf16 %v599_v54, %v598_v46  ;;  %v239_v57 = vpop.f32.mrb[7].mxu0  ;;  %v544_v58 = vpack.c.bf16 %v607_v55, %v606_v48  ;;  %v271_v59 = vpop.f32.mrb[7].mxu1  ;;  %v391_v4 = vmul.f32 %v599_v54, %v599_v54 }
 0x101   :  { %v403_v60 = vadd.f32 %v402_v53, %v388_v52  ;;  %v519_v61 = vpack.c.bf16 %v239_v57, %v236_v49  ;;  %v367_v62 = vadd.f32 %v366_v51, %v239_v57  ;;  %v389_v63 = vmul.f32 %v239_v57, %v239_v57 }
 0x102   :  { %555 = vst [vmem:[%s783_s4 + $0x18] sm:$0xff] %v524_v56   ;;  %559 = vst [vmem:[%s783_s4 + $0x38] sm:$0xff] %v544_v58   ;;  %v539_v0 = vpack.c.bf16 %v271_v59, %v268_v50  ;;  %v397_v25 = vmul.f32 %v271_v59, %v271_v59 }
 0x103   :  { %554 = vst [vmem:[%s783_s4 + $0x10] sm:$0xff] %v519_v61   ;;  %v368_v2 = vadd.f32 %v598_v46, %v367_v62  ;;  %v404_v3 = vadd.f32 %v403_v60, %v389_v63 }
 0x104   :  { %558 = vst [vmem:[%s783_s4 + $0x30] sm:$0xff] %v539_v0  }
 0x105   :  { %v405_v6 = vadd.f32 %v404_v3, %v390_v1  ;;  %v369_v7 = vadd.f32 %v599_v54, %v368_v2 }
 0x107   :  { %v370_v9 = vadd.f32 %v369_v7, %v252_v10  ;;  %v406_v11 = vadd.f32 %v405_v6, %v391_v4  ;;  %v399_v10 = vmul.f32 %v607_v55, %v607_v55 }
 0x109   :  { %v407_v12 = vadd.f32 %v406_v11, %v392_v8  ;;  %v371_v13 = vadd.f32 %v370_v9, %v255_v36 }
 0x10b   :  { %v372_v16 = vadd.f32 %v602_v28, %v371_v13  ;;  %v408_v17 = vadd.f32 %v407_v12, %v393_v14 }
 0x10d   :  { %v409_v19 = vadd.f32 %v408_v17, %v394_v15  ;;  %v373_v5 = vadd.f32 %v603_v31, %v372_v16 }
 0x10f   :  { %v374_v21 = vadd.f32 %v373_v5, %v268_v50  ;;  %v410_v22 = vadd.f32 %v409_v19, %v395_v18 }
 0x111   :  { %v411_v23 = vadd.f32 %v410_v22, %v396_v20  ;;  %v375_v24 = vadd.f32 %v374_v21, %v271_v59 }
 0x113   :  { %v376_v27 = vadd.f32 %v606_v48, %v375_v24  ;;  %v412_v29 = vadd.f32 %v411_v23, %v397_v25 }
 0x115   :  { %v377_v30 = vadd.f32 %v607_v55, %v376_v27  ;;  %v413_v32 = vadd.f32 %v412_v29, %v398_v26 }
 0x117   :  { %v378_v33 = vrot.slane %v377_v30, 4  ;;  %v414_v34 = vadd.f32 %v413_v32, %v399_v10 }
 0x119   :  { %v379_v35 = vadd.f32 %v378_v33, %v377_v30  ;;  %v415_v28 = vrot.slane %v414_v34, 4 }
 0x11b   :  { %v380_v36 = vrot.slane %v379_v35, 2  ;;  %v416_v37 = vadd.f32 %v415_v28, %v414_v34 }
 0x11d   :  { %v381_v38 = vadd.f32 %v380_v36, %v379_v35  ;;  %v417_v31 = vrot.slane %v416_v37, 2 }
 0x11f   :  { %v382_v39 = vrot.slane %v381_v38, 1  ;;  %v418_v40 = vadd.f32 %v417_v31, %v416_v37 }
 0x121   :  { %v419_v41 = vrot.slane %v418_v40, 1  ;;  %v383_v42 = vadd.f32 %v382_v39, %v381_v38 }
 0x123   :  { %v420_v43 = vadd.f32 %v419_v41, %v418_v40 }
 0x125   :  { %v422_v44 = vsel %vm421_vm0, %v383_v42, %v420_v43 }
 0x126   :  { %423 = vst [vmem:[%s784_s5] sm:$0x3] %v422_v44 }

// kernel: bottleneck_forward.4
= control target key start
LH: loop header
LB: loop body
LE: loop exit
PB: predicated region body
PF: predicated region fallthrough
CT: control target
= control target key end

     0   :  { %v817_v1 = vmov 0   ;;  %vm507_vm0 = vcmask 1040384   ;;  %s1060_s1 = inlined_call_operand.vmem [shape: bf16[128,256], index: 1, kind: input, shape index: {}]   ;;  %s1061_s0 = inlined_call_operand.vmem [shape: bf16[128,128], index: 0, kind: input, shape index: {}]   ;;  %s1062_s2 = inlined_call_operand.vmem [shape: bf16[128,128], index: 2, kind: output, shape index: {0}]   ;;  %s1063_s3 = inlined_call_operand.vmem [shape: bf16[128,128], index: 3, kind: output, shape index: {1}]   ;;  %s1064_s4 = inlined_call_operand.vmem [shape: f32[1,2,128], index: 4, kind: output, shape index: {2}]   ;;  %s1065_s5 = inlined_call_operand.vmem [shape: f32[1,2,128], index: 5, kind: output, shape index: {3}]  }
   0x1   :  { %v785_v0 = vld [vmem:[%s1060_s1 + $0x4] ss:$8 sps:$4 sm:$0xff]   ;;  %208 = vmatprep.mubr.bf16.mxu0 %v817_v1  ;;  %248 = vmatprep.mubr.bf16.mxu1 %v817_v1  ;;  %v787_v2 = vld [vmem:[%s1060_s1] ss:$8 sps:$4 sm:$0xff]   ;;  %v788_v3 = vld [vmem:[%s1060_s1 + $0x14] ss:$8 sps:$4 sm:$0xff]  }
   0x2   :  { %176 = vmatprep.subr.bf16.mxu0 %v785_v0  ;;  %768 = vmatprep.subr.bf16.mxu1 %v785_v0  ;;  %v790_v4 = vld [vmem:[%s1060_s1 + $0x10] ss:$8 sps:$4 sm:$0xff]   ;;  %v791_v5 = vld [vmem:[%s1060_s1 + $0x24] ss:$8 sps:$4 sm:$0xff]   ;;  %v793_v6 = vld [vmem:[%s1060_s1 + $0x20] ss:$8 sps:$4 sm:$0xff]  }
   0x3   :  { %177 = vmatpush1.bf16.msra.mxu0 %v787_v2  ;;  %776 = vmatpush1.bf16.msra.mxu1 %v787_v2  ;;  %v794_v7 = vld [vmem:[%s1060_s1 + $0x34] ss:$8 sps:$4 sm:$0xff]   ;;  %v796_v8 = vld [vmem:[%s1060_s1 + $0x30] ss:$8 sps:$4 sm:$0xff]   ;;  %v797_v9 = vld [vmem:[%s1060_s1 + $0x44] ss:$8 sps:$4 sm:$0xff]  }
   0x4   :  { %178 = vmatprep.subr.bf16.mxu0 %v788_v3  ;;  %769 = vmatprep.subr.bf16.mxu1 %v788_v3  ;;  %v799_v10 = vld [vmem:[%s1060_s1 + $0x40] ss:$8 sps:$4 sm:$0xff]   ;;  %v800_v11 = vld [vmem:[%s1060_s1 + $0x54] ss:$8 sps:$4 sm:$0xff]   ;;  %v802_v12 = vld [vmem:[%s1060_s1 + $0x50] ss:$8 sps:$4 sm:$0xff]  }
   0x5   :  { %v803_v13 = vld [vmem:[%s1060_s1 + $0x64] ss:$8 sps:$4 sm:$0xff]   ;;  %v805_v14 = vld [vmem:[%s1060_s1 + $0x60] ss:$8 sps:$4 sm:$0xff]   ;;  %v806_v15 = vld [vmem:[%s1060_s1 + $0x74] ss:$8 sps:$4 sm:$0xff]  }
   0x6   :  { %v808_v16 = vld [vmem:[%s1060_s1 + $0x70] ss:$8 sps:$4 sm:$0xff]   ;;  %v809_v17 = vld [vmem:[%s1061_s0] sm:$0xff]   ;;  %v810_v19 = vld [vmem:[%s1061_s0 + $0x8] sm:$0xff]  }
   0x7   :  { %179 = vmatpush1.bf16.msra.mxu0 %v790_v4  ;;  %777 = vmatpush1.bf16.msra.mxu1 %v790_v4  ;;  %v811_v18 = vld [vmem:[%s1061_s0 + $0x20] sm:$0xff]   ;;  %v813_v20 = vld [vmem:[%s1061_s0 + $0x28] sm:$0xff]   ;;  %v812_v21 = vld [vmem:[%s1061_s0 + $0x10] sm:$0xff]  }
   0x8   :  { %180 = vmatprep.subr.bf16.mxu0 %v791_v5  ;;  %770 = vmatprep.subr.bf16.mxu1 %v791_v5  ;;  %v815_v22 = vld [vmem:[%s1061_s0 + $0x30] sm:$0xff]   ;;  %v814_v23 = vld [vmem:[%s1061_s0 + $0x18] sm:$0xff]  }
   0x9   :  { %v816_v24 = vld [vmem:[%s1061_s0 + $0x38] sm:$0xff]  }
   0xb   :  { %181 = vmatpush1.bf16.msra.mxu0 %v793_v6  ;;  %778 = vmatpush1.bf16.msra.mxu1 %v793_v6 }
   0xc   :  { %182 = vmatprep.subr.bf16.mxu0 %v794_v7  ;;  %771 = vmatprep.subr.bf16.mxu1 %v794_v7 }
   0xf   :  { %183 = vmatpush1.bf16.msra.mxu0 %v796_v8  ;;  %779 = vmatpush1.bf16.msra.mxu1 %v796_v8 }
  0x10   :  { %184 = vmatprep.subr.bf16.mxu0 %v797_v9  ;;  %772 = vmatprep.subr.bf16.mxu1 %v797_v9 }
  0x13   :  { %185 = vmatpush1.bf16.msra.mxu0 %v799_v10  ;;  %780 = vmatpush1.bf16.msra.mxu1 %v799_v10 }
  0x14   :  { %186 = vmatprep.subr.bf16.mxu0 %v800_v11  ;;  %773 = vmatprep.subr.bf16.mxu1 %v800_v11 }
  0x17   :  { %187 = vmatpush1.bf16.msra.mxu0 %v802_v12  ;;  %781 = vmatpush1.bf16.msra.mxu1 %v802_v12 }
  0x18   :  { %188 = vmatprep.subr.bf16.mxu0 %v803_v13  ;;  %774 = vmatprep.subr.bf16.mxu1 %v803_v13 }
  0x1b   :  { %189 = vmatpush1.bf16.msra.mxu0 %v805_v14  ;;  %782 = vmatpush1.bf16.msra.mxu1 %v805_v14 }
  0x1c   :  { %190 = vmatprep.subr.bf16.mxu0 %v806_v15  ;;  %775 = vmatprep.subr.bf16.mxu1 %v806_v15 }
  0x1f   :  { %191 = vmatpush1.bf16.msra.mxu0 %v808_v16  ;;  %783 = vmatpush1.bf16.msra.mxu1 %v808_v16 }
  0x22   :  { %209 = vmatmul.mubr.bf16.vlgmr.msra.gmra.mrb[0].mxu0 %v809_v17  ;;  %249 = vmatmul.mubr.bf16.vlgmr.msra.gmra.mrb[0].mxu1 %v811_v18 }
  0x23   :  { %218 = vmatprep.mubr.bf16.mxu0 %v817_v1  ;;  %258 = vmatprep.mubr.bf16.mxu1 %v817_v1 }
  0x2a   :  { %219 = vmatmul.mubr.bf16.gmra.mrb[4].mxu0 %v810_v19  ;;  %259 = vmatmul.mubr.bf16.gmra.mrb[4].mxu1 %v813_v20 }
  0x2b   :  { %228 = vmatprep.mubr.bf16.mxu0 %v817_v1  ;;  %268 = vmatprep.mubr.bf16.mxu1 %v817_v1 }
  0x32   :  { %229 = vmatmul.mubr.bf16.gmra.mrb[8].mxu0 %v812_v21  ;;  %269 = vmatmul.mubr.bf16.gmra.mrb[8].mxu1 %v815_v22 }
  0x33   :  { %238 = vmatprep.mubr.bf16.mxu0 %v817_v1  ;;  %278 = vmatprep.mubr.bf16.mxu1 %v817_v1 }
  0x3a   :  { %239 = vmatmul.mubr.bf16.gmra.mrb[12].mxu0 %v814_v23  ;;  %279 = vmatmul.mubr.bf16.gmra.mrb[12].mxu1 %v816_v24 }
  0xf5   :  { %v210_v25 = vpop.f32.mrb[0].mxu0  ;;  %v928_v26 = vpop.f32.mrb[0].mxu1 }
  0xf6   :  { %v212_v27 = vpop.f32.mrb[1].mxu0  ;;  %v930_v28 = vpop.f32.mrb[1].mxu1  ;;  %v470_v29 = vmul.f32 %v210_v25, %v210_v25 }
  0xf7   :  { %v214_v30 = vpop.f32.mrb[2].mxu0  ;;  %v932_v31 = vpop.f32.mrb[2].mxu1  ;;  %v531_v38 = vmul.f32 %v212_v27, %v212_v27 }
  0xf8   :  { %v677_v32 = vpack.c.bf16 %v214_v30, %v210_v25  ;;  %v449_v33 = vadd.f32 %v214_v30, %v210_v25  ;;  %v471_v34 = vmul.f32 %v214_v30, %v214_v30  ;;  %v216_v35 = vpop.f32.mrb[3].mxu0  ;;  %v697_v36 = vpack.c.bf16 %v932_v31, %v928_v26  ;;  %v936_v37 = vpop.f32.mrb[3].mxu1 }
  0xf9   :  { %v717_v39 = vpack.c.bf16 %v216_v35, %v212_v27  ;;  %v510_v40 = vadd.f32 %v216_v35, %v212_v27  ;;  %v532_v41 = vmul.f32 %v216_v35, %v216_v35  ;;  %v737_v43 = vpack.c.bf16 %v936_v37, %v930_v28 }
  0xfa   :  { %678 = vst [vmem:[%s1062_s2] sm:$0xff] %v677_v32   ;;  %v486_v42 = vadd.f32 %v471_v34, %v470_v29  ;;  %757 = vst [vmem:[%s1062_s2 + $0x20] sm:$0xff] %v697_v36  }
  0xfb   :  { %718 = vst [vmem:[%s1063_s3] sm:$0xff] %v717_v39   ;;  %v547_v44 = vadd.f32 %v532_v41, %v531_v38  ;;  %764 = vst [vmem:[%s1063_s3 + $0x20] sm:$0xff] %v737_v43  }
  0xfd   :  { %v220_v45 = vpop.f32.mrb[4].mxu0  ;;  %v952_v46 = vpop.f32.mrb[4].mxu1 }
  0xfe   :  { %v450_v47 = vadd.f32 %v449_v33, %v220_v45  ;;  %v472_v48 = vmul.f32 %v220_v45, %v220_v45  ;;  %v222_v49 = vpop.f32.mrb[5].mxu0  ;;  %v954_v50 = vpop.f32.mrb[5].mxu1 }
  0xff   :  { %v511_v51 = vadd.f32 %v510_v40, %v222_v49  ;;  %v533_v52 = vmul.f32 %v222_v49, %v222_v49  ;;  %v224_v53 = vpop.f32.mrb[6].mxu0  ;;  %v956_v54 = vpop.f32.mrb[6].mxu1 }
 0x100   :  { %v487_v55 = vadd.f32 %v486_v42, %v472_v48  ;;  %v682_v56 = vpack.c.bf16 %v224_v53, %v220_v45  ;;  %v451_v57 = vadd.f32 %v450_v47, %v224_v53  ;;  %v473_v58 = vmul.f32 %v224_v53, %v224_v53  ;;  %v226_v59 = vpop.f32.mrb[7].mxu0  ;;  %v958_v60 = vpop.f32.mrb[7].mxu1 }
 0x101   :  { %v548_v61 = vadd.f32 %v547_v44, %v533_v52  ;;  %v722_v62 = vpack.c.bf16 %v226_v59, %v222_v49  ;;  %v512_v63 = vadd.f32 %v511_v51, %v226_v59  ;;  %v534_v0 = vmul.f32 %v226_v59, %v226_v59 }
 0x102   :  { %754 = vst [vmem:[%s1062_s2 + $0x8] sm:$0xff] %v682_v56   ;;  %v488_v1 = vadd.f32 %v487_v55, %v473_v58  ;;  %v702_v2 = vpack.c.bf16 %v956_v54, %v952_v46  ;;  %v742_v3 = vpack.c.bf16 %v958_v60, %v954_v50  ;;  %v478_v56 = vmul.f32 %v928_v26, %v928_v26 }
 0x103   :  { %761 = vst [vmem:[%s1063_s3 + $0x8] sm:$0xff] %v722_v62   ;;  %v549_v4 = vadd.f32 %v548_v61, %v534_v0  ;;  %v539_v61 = vmul.f32 %v930_v28, %v930_v28 }
 0x104   :  { %758 = vst [vmem:[%s1062_s2 + $0x28] sm:$0xff] %v702_v2   ;;  %765 = vst [vmem:[%s1063_s3 + $0x28] sm:$0xff] %v742_v3   ;;  %v540_v3 = vmul.f32 %v936_v37, %v936_v37 }
 0x105   :  { %v230_v5 = vpop.f32.mrb[8].mxu0  ;;  %v976_v6 = vpop.f32.mrb[8].mxu1 }
 0x106   :  { %v452_v7 = vadd.f32 %v451_v57, %v230_v5  ;;  %v474_v8 = vmul.f32 %v230_v5, %v230_v5  ;;  %v232_v9 = vpop.f32.mrb[9].mxu0  ;;  %v978_v10 = vpop.f32.mrb[9].mxu1 }
 0x107   :  { %v513_v11 = vadd.f32 %v512_v63, %v232_v9  ;;  %v535_v12 = vmul.f32 %v232_v9, %v232_v9  ;;  %v234_v13 = vpop.f32.mrb[10].mxu0  ;;  %v980_v14 = vpop.f32.mrb[10].mxu1 }
 0x108   :  { %v489_v15 = vadd.f32 %v488_v1, %v474_v8  ;;  %v687_v16 = vpack.c.bf16 %v234_v13, %v230_v5  ;;  %v453_v17 = vadd.f32 %v452_v7, %v234_v13  ;;  %v475_v18 = vmul.f32 %v234_v13, %v234_v13  ;;  %v236_v19 = vpop.f32.mrb[11].mxu0  ;;  %v982_v20 = vpop.f32.mrb[11].mxu1 }
 0x109   :  { %v550_v21 = vadd.f32 %v549_v4, %v535_v12  ;;  %v727_v22 = vpack.c.bf16 %v236_v19, %v232_v9  ;;  %v514_v23 = vadd.f32 %v513_v11, %v236_v19  ;;  %v536_v24 = vmul.f32 %v236_v19, %v236_v19 }
 0x10a   :  { %755 = vst [vmem:[%s1062_s2 + $0x10] sm:$0xff] %v687_v16   ;;  %v490_v25 = vadd.f32 %v489_v15, %v475_v18  ;;  %v707_v27 = vpack.c.bf16 %v980_v14, %v976_v6  ;;  %v747_v29 = vpack.c.bf16 %v982_v20, %v978_v10  ;;  %v479_v1 = vmul.f32 %v932_v31, %v932_v31 }
 0x10b   :  { %762 = vst [vmem:[%s1063_s3 + $0x10] sm:$0xff] %v727_v22   ;;  %v551_v30 = vadd.f32 %v550_v21, %v536_v24  ;;  %v541_v8 = vmul.f32 %v954_v50, %v954_v50  ;;  %v542_v15 = vmul.f32 %v958_v60, %v958_v60  ;;  %v482_v18 = vmul.f32 %v976_v6, %v976_v6 }
 0x10c   :  { %759 = vst [vmem:[%s1062_s2 + $0x30] sm:$0xff] %v707_v27   ;;  %766 = vst [vmem:[%s1063_s3 + $0x30] sm:$0xff] %v747_v29   ;;  %v543_v21 = vmul.f32 %v978_v10, %v978_v10  ;;  %v483_v24 = vmul.f32 %v980_v14, %v980_v14 }
 0x10d   :  { %v240_v32 = vpop.f32.mrb[12].mxu0  ;;  %v1000_v33 = vpop.f32.mrb[12].mxu1 }
 0x10e   :  { %v454_v34 = vadd.f32 %v453_v17, %v240_v32  ;;  %v476_v35 = vmul.f32 %v240_v32, %v240_v32  ;;  %v242_v36 = vpop.f32.mrb[13].mxu0  ;;  %v282_v38 = vpop.f32.mrb[13].mxu1 }
 0x10f   :  { %v515_v39 = vadd.f32 %v514_v23, %v242_v36  ;;  %v537_v40 = vmul.f32 %v242_v36, %v242_v36  ;;  %v244_v41 = vpop.f32.mrb[14].mxu0  ;;  %v284_v42 = vpop.f32.mrb[14].mxu1  ;;  %v545_v29 = vmul.f32 %v282_v38, %v282_v38 }
 0x110   :  { %v491_v43 = vadd.f32 %v490_v25, %v476_v35  ;;  %v692_v44 = vpack.c.bf16 %v244_v41, %v240_v32  ;;  %v455_v45 = vadd.f32 %v454_v34, %v244_v41  ;;  %v477_v47 = vmul.f32 %v244_v41, %v244_v41  ;;  %v246_v48 = vpop.f32.mrb[15].mxu0  ;;  %v286_v49 = vpop.f32.mrb[15].mxu1 }
 0x111   :  { %v552_v51 = vadd.f32 %v551_v30, %v537_v40  ;;  %v732_v52 = vpack.c.bf16 %v246_v48, %v242_v36  ;;  %v516_v53 = vadd.f32 %v515_v39, %v246_v48  ;;  %v538_v55 = vmul.f32 %v246_v48, %v246_v48 }
 0x112   :  { %756 = vst [vmem:[%s1062_s2 + $0x18] sm:$0xff] %v692_v44   ;;  %v456_v57 = vadd.f32 %v455_v45, %v928_v26  ;;  %v492_v58 = vadd.f32 %v491_v43, %v477_v47  ;;  %v712_v59 = vpack.c.bf16 %v284_v42, %v1000_v33  ;;  %v752_v0 = vpack.c.bf16 %v286_v49, %v282_v38 }
 0x113   :  { %763 = vst [vmem:[%s1063_s3 + $0x18] sm:$0xff] %v732_v52   ;;  %v517_v62 = vadd.f32 %v516_v53, %v930_v28  ;;  %v553_v63 = vadd.f32 %v552_v51, %v538_v55  ;;  %v480_v28 = vmul.f32 %v952_v46, %v952_v46  ;;  %v485_v39 = vmul.f32 %v284_v42, %v284_v42 }
 0x114   :  { %v457_v2 = vadd.f32 %v456_v57, %v932_v31  ;;  %v493_v26 = vadd.f32 %v492_v58, %v478_v56  ;;  %760 = vst [vmem:[%s1062_s2 + $0x38] sm:$0xff] %v712_v59   ;;  %767 = vst [vmem:[%s1063_s3 + $0x38] sm:$0xff] %v752_v0   ;;  %v546_v41 = vmul.f32 %v286_v49, %v286_v49 }
 0x115   :  { %v518_v4 = vadd.f32 %v517_v62, %v936_v37  ;;  %v554_v5 = vadd.f32 %v553_v63, %v539_v61  ;;  %v481_v37 = vmul.f32 %v956_v54, %v956_v54 }
 0x116   :  { %v494_v7 = vadd.f32 %v493_v26, %v479_v1  ;;  %v458_v31 = vadd.f32 %v457_v2, %v952_v46 }
 0x117   :  { %v555_v9 = vadd.f32 %v554_v5, %v540_v3  ;;  %v519_v11 = vadd.f32 %v518_v4, %v954_v50 }
 0x118   :  { %v459_v12 = vadd.f32 %v458_v31, %v956_v54  ;;  %v495_v13 = vadd.f32 %v494_v7, %v480_v28 }
 0x119   :  { %v520_v16 = vadd.f32 %v519_v11, %v958_v60  ;;  %v556_v17 = vadd.f32 %v555_v9, %v541_v8  ;;  %v484_v60 = vmul.f32 %v1000_v33, %v1000_v33 }
 0x11a   :  { %v460_v46 = vadd.f32 %v459_v12, %v976_v6  ;;  %v496_v19 = vadd.f32 %v495_v13, %v481_v37  ;;  %v544_v6 = vmul.f32 %v982_v20, %v982_v20 }
 0x11b   :  { %v521_v50 = vadd.f32 %v520_v16, %v978_v10  ;;  %v557_v22 = vadd.f32 %v556_v17, %v542_v15 }
 0x11c   :  { %v497_v54 = vadd.f32 %v496_v19, %v482_v18  ;;  %v461_v23 = vadd.f32 %v460_v46, %v980_v14 }
 0x11d   :  { %v558_v25 = vadd.f32 %v557_v22, %v543_v21  ;;  %v522_v27 = vadd.f32 %v521_v50, %v982_v20 }
 0x11e   :  { %v498_v30 = vadd.f32 %v497_v54, %v483_v24  ;;  %v462_v10 = vadd.f32 %v461_v23, %v1000_v33 }
 0x11f   :  { %v559_v32 = vadd.f32 %v558_v25, %v544_v6  ;;  %v523_v34 = vadd.f32 %v522_v27, %v282_v38 }
 0x120   :  { %v499_v35 = vadd.f32 %v498_v30, %v484_v60  ;;  %v463_v36 = vadd.f32 %v462_v10, %v284_v42 }
 0x121   :  { %v560_v40 = vadd.f32 %v559_v32, %v545_v29  ;;  %v524_v14 = vadd.f32 %v523_v34, %v286_v49 }
 0x122   :  { %v464_v43 = vrot.slane %v463_v36, 4  ;;  %v500_v44 = vadd.f32 %v499_v35, %v485_v39 }
 0x123   :  { %v525_v45 = vrot.slane %v524_v14, 4  ;;  %v561_v47 = vadd.f32 %v560_v40, %v546_v41 }
 0x124   :  { %v465_v48 = vadd.f32 %v464_v43, %v463_v36  ;;  %v501_v51 = vrot.slane %v500_v44, 4 }
 0x125   :  { %v526_v52 = vadd.f32 %v525_v45, %v524_v14  ;;  %v562_v20 = vrot.slane %v561_v47, 4 }
 0x126   :  { %v466_v53 = vrot.slane %v465_v48, 2  ;;  %v502_v55 = vadd.f32 %v501_v51, %v500_v44 }
 0x127   :  { %v527_v56 = vrot.slane %v526_v52, 2  ;;  %v563_v33 = vadd.f32 %v562_v20, %v561_v47 }
 0x128   :  { %v467_v57 = vadd.f32 %v466_v53, %v465_v48  ;;  %v503_v38 = vrot.slane %v502_v55, 2 }
 0x129   :  { %v528_v58 = vadd.f32 %v527_v56, %v526_v52  ;;  %v564_v59 = vrot.slane %v563_v33, 2 }
 0x12a   :  { %v468_v42 = vrot.slane %v467_v57, 1  ;;  %v504_v61 = vadd.f32 %v503_v38, %v502_v55 }
 0x12b   :  { %v529_v62 = vrot.slane %v528_v58, 1  ;;  %v565_v49 = vadd.f32 %v564_v59, %v563_v33 }
 0x12c   :  { %v505_v63 = vrot.slane %v504_v61, 1  ;;  %v469_v1 = vadd.f32 %v468_v42, %v467_v57 }
 0x12d   :  { %v566_v0 = vrot.slane %v565_v49, 1  ;;  %v530_v26 = vadd.f32 %v529_v62, %v528_v58 }
 0x12e   :  { %v506_v2 = vadd.f32 %v505_v63, %v504_v61 }
 0x12f   :  { %v567_v3 = vadd.f32 %v566_v0, %v565_v49 }
 0x130   :  { %v508_v4 = vsel %vm507_vm0, %v469_v1, %v506_v2 }
 0x131   :  { %509 = vst [vmem:[%s1064_s4] sm:$0x3] %v508_v4  ;;  %v568_v5 = vsel %vm507_vm0, %v530_v26, %v567_v3 }
 0x132   :  { %569 = vst [vmem:[%s1065_s5] sm:$0x3] %v568_v5 }

// kernel: bottleneck_forward.5
= control target key start
LH: loop header
LB: loop body
LE: loop exit
PB: predicated region body
PF: predicated region fallthrough
CT: control target
= control target key end

     0   :  { %s2316_s18 = smov 0   ;;  %s2772_s0 = inlined_call_operand.vmem [shape: bf16[2,8,8,128], index: 0, kind: input, shape index: {}]   ;;  %s2773_s1 = inlined_call_operand.vmem [shape: f32[1,128], index: 1, kind: input, shape index: {}]   ;;  %s2774_s2 = inlined_call_operand.vmem [shape: f32[1,128], index: 2, kind: input, shape index: {}]   ;;  %s2775_s3 = inlined_call_operand.vmem [shape: bf16[3,384,128], index: 3, kind: input, shape index: {}]   ;;  %s2776_s4 = inlined_call_operand.vmem [shape: bf16[2,64,128], index: 4, kind: output, shape index: {0}]   ;;  %s2777_s5 = inlined_call_operand.vmem [shape: f32[2,2,128], index: 5, kind: output, shape index: {1}]  }
   0x1 LB: > { %s1652_s19 = sadd.s32 4294967295, %s2283_s18   ;;  %p1656_p0 = scmp.ge.s32.totalorder %s2283_s18, 1  ;;  %s2283_s18 = sphi %s2316_s18, %s16_s18  }
   0x2   : > { %p190_p1 = scmp.lt.s32.totalorder %s2283_s18, 3 }
   0x4   : > { %p191_p2 = pnand %p1656_p0, %p190_p1 }
   0x5   : > { %v2205_v0 = vld [vmem:[%s2775_s3 + $0x100] sm:$0xff] (!%p191_p2)   ;;  %v2208_v3 = vld [vmem:[%s2775_s3 + $0x108] sm:$0xff] (!%p191_p2)   ;;  %v2211_v6 = vld [vmem:[%s2775_s3 + $0x110] sm:$0xff] (!%p191_p2)   ;;  %p222_p3 = scmp.lt.s32.totalorder (!%p191_p2), %s1652_s19, 1  ;;  %vm364_vm0 = vsmask.f32 (!%p191_p2), 256 }
   0x6   : > { %194 = sbr.rel (%p191_p2) target bundleno = 366 (0x16e), region = 36  ;;  %v2206_v1 = vld [vmem:[%s2775_s3 + $0x140] sm:$0xff] (!%p191_p2)   ;;  %1928 = vmatprep.subr.bf16.mxu0 (!%p191_p2), %v2205_v0  ;;  %v2209_v4 = vld [vmem:[%s2775_s3 + $0x148] sm:$0xff] (!%p191_p2)   ;;  %v2212_v7 = vld [vmem:[%s2775_s3 + $0x150] sm:$0xff] (!%p191_p2)   ;;  %vm363_vm1 = vcmask (!%p191_p2), 1040384   ;;  %vm398_vm2 = vcmask (!%p191_p2), 1043456  }
   0x7   : > { %v2207_v2 = vld [vmem:[%s2775_s3 + $0xc0] sm:$0xff] (!%p191_p2)   ;;  %2084 = vmatprep.subr.bf16.mxu1 (!%p191_p2), %v2206_v1  ;;  %v2210_v5 = vld [vmem:[%s2775_s3 + $0xc8] sm:$0xff] (!%p191_p2)   ;;  %v2213_v8 = vld [vmem:[%s2775_s3 + $0xd0] sm:$0xff] (!%p191_p2)   ;;  %vm399_vm3 = vsmask.f32 (!%p191_p2), 3328 }
   0x8   : > { %1929 = vmatpush3.bf16.msra.mxu0 (!%p191_p2), %v2207_v2  ;;  %2085 = vmatpush3.bf16.msra.mxu1 (!%p191_p2), %v2206_v1  ;;  %v2214_v9 = vld [vmem:[%s2775_s3 + $0x118] sm:$0xff] (!%p191_p2)   ;;  %v2217_v12 = vld [vmem:[%s2775_s3 + $0x120] sm:$0xff] (!%p191_p2)   ;;  %v2220_v15 = vld [vmem:[%s2775_s3 + $0x128] sm:$0xff] (!%p191_p2)  }
   0x9   : > { %1930 = vmatprep.subr.bf16.mxu0 (!%p191_p2), %v2208_v3  ;;  %2086 = vmatprep.subr.bf16.mxu1 (!%p191_p2), %v2209_v4  ;;  %v2215_v10 = vld [vmem:[%s2775_s3 + $0x158] sm:$0xff] (!%p191_p2)   ;;  %v2218_v13 = vld [vmem:[%s2775_s3 + $0x160] sm:$0xff] (!%p191_p2)   ;;  %v2221_v16 = vld [vmem:[%s2775_s3 + $0x168] sm:$0xff] (!%p191_p2)  }
   0xa   : > { %v2216_v11 = vld [vmem:[%s2775_s3 + $0xd8] sm:$0xff] (!%p191_p2)   ;;  %v2219_v14 = vld [vmem:[%s2775_s3 + $0xe0] sm:$0xff] (!%p191_p2)   ;;  %v2222_v17 = vld [vmem:[%s2775_s3 + $0xe8] sm:$0xff] (!%p191_p2)  }
   0xb   : > { %v2223_v18 = vld [vmem:[%s2775_s3 + $0x130] sm:$0xff] (!%p191_p2)   ;;  %v2406_v23 = vld [vmem:[%s2773_s1] ss:$0 sm:$0xff] (!%p191_p2)  ;;  %v2226_v24 = vld [vmem:[%s2775_s3 + $0x138] sm:$0xff] (!%p191_p2)  }
   0xc   : > { %1931 = vmatpush3.bf16.msra.mxu0 (!%p191_p2), %v2210_v5  ;;  %2087 = vmatpush3.bf16.msra.mxu1 (!%p191_p2), %v2209_v4  ;;  %v2224_v19 = vld [vmem:[%s2775_s3 + $0x170] sm:$0xff] (!%p191_p2)   ;;  %v2227_v25 = vld [vmem:[%s2775_s3 + $0x178] sm:$0xff] (!%p191_p2)   ;;  %v2417_v30 = vld [vmem:[%s2774_s2] ss:$0 sm:$0xff] (!%p191_p2) }
   0xd   : > { %1932 = vmatprep.subr.bf16.mxu0 %v2211_v6  ;;  %2088 = vmatprep.subr.bf16.mxu1 %v2212_v7  ;;  %s2783_s19 = smov (!%p222_p3, %s1652_s19), 1  ;;  %v2225_v20 = vld [vmem:[%s2775_s3 + $0xf0] sm:$0xff]   ;;  %v2228_v31 = vld [vmem:[%s2775_s3 + $0xf8] sm:$0xff]   ;;  %v2229_v39 = vld [vmem:[%s2775_s3 + $0x40] sm:$0xff]  }
   0xe   : > { %s1869_s6 = sshll.u32 %s2783_s19, 5  ;;  %v2435_v40 = vld [vmem:[%s2775_s3 + $0x80] sm:$0xff]   ;;  %vm2460_vm4 = vmand %vm363_vm1, %vm364_vm0  ;;  %v2252_v2 = vld [vmem:[%s2775_s3 + $0x38] sm:$0xff]  }
   0xf   : > { %s2396_s15 = scalar_lea.vmem %s2772_s0, %s1869_s6  ;;  %vm2466_vm5 = vmand %vm398_vm2, %vm399_vm3  ;;  %s2756_s17 = scalar_lea.vmem %s2776_s4, %s1869_s6 }
  0x10   : > { %1933 = vmatpush3.bf16.msra.mxu0 %v2213_v8  ;;  %2089 = vmatpush3.bf16.msra.mxu1 %v2212_v7  ;;  %v1887_v21 = vld [vmem:[%s2396_s15] sm:$0xff]   ;;  %v1922_v22 = vld [vmem:[%s2396_s15 + $0x8] sm:$0xff]   ;;  %s1661_s6 = sshll.u32 %s2783_s19, 1 }
  0x11   : > { %1934 = vmatprep.subr.bf16.mxu0 %v2214_v9  ;;  %2090 = vmatprep.subr.bf16.mxu1 %v2215_v10  ;;  %v1888_v26 = vunpack.c.l.bf16 %v1887_v21  ;;  %v1889_v27 = vunpack.c.h.bf16 %v1887_v21  ;;  %v1892_v28 = vunpack.c.l.bf16 %v1922_v22  ;;  %v1893_v29 = vunpack.c.h.bf16 %v1922_v22  ;;  %s235_s22 = scalar_lea.vmem %s2777_s5, %s1661_s6 }
  0x13   : > { %v260_v32 = vmul.f32 %v1888_v26, %v2406_v23  ;;  %v261_v33 = vmul.f32 %v1889_v27, %v2406_v23  ;;  %v262_v34 = vmul.f32 %v1892_v28, %v2406_v23  ;;  %v263_v35 = vmul.f32 %v1893_v29, %v2406_v23  ;;  %v2233_v26 = vld [vmem:[%s2775_s3 + $0x88] sm:$0xff]  }
  0x14   : > { %1935 = vmatpush3.bf16.msra.mxu0 %v2216_v11  ;;  %2091 = vmatpush3.bf16.msra.mxu1 %v2215_v10  ;;  %v2234_v29 = vld [vmem:[%s2775_s3 + $0x8] sm:$0xff]  }
  0x15   : > { %1936 = vmatprep.subr.bf16.mxu0 %v2217_v12  ;;  %2092 = vmatprep.subr.bf16.mxu1 %v2218_v13  ;;  %v275_v36 = vadd.f32 %v2417_v30, %v260_v32  ;;  %v276_v37 = vadd.f32 %v2417_v30, %v261_v33  ;;  %v277_v38 = vadd.f32 %v2417_v30, %v262_v34  ;;  %v2231_v12 = vld [vmem:[%s2775_s3] sm:$0xff]   ;;  %v2235_v34 = vld [vmem:[%s2775_s3 + $0x50] sm:$0xff]  }
  0x16   : > { %v278_v41 = vadd.f32 %v2417_v30, %v263_v35 }
  0x17   : > { %v283_v42 = vmax.f32 %v275_v36, 0.0  ;;  %v2438_v43 = vmax.f32 %v276_v37, 0.0  ;;  %v2440_v44 = vmax.f32 %v277_v38, 0.0  ;;  %v2236_v38 = vld [vmem:[%s2775_s3 + $0x90] sm:$0xff]  }
  0x18   : > { %1937 = vmatpush3.bf16.msra.mxu0 %v2219_v14  ;;  %2093 = vmatpush3.bf16.msra.mxu1 %v2218_v13  ;;  %v2442_v45 = vmax.f32 %v278_v41, 0.0  ;;  %v2237_v41 = vld [vmem:[%s2775_s3 + $0x10] sm:$0xff]  }
  0x19   : > { %1938 = vmatprep.subr.bf16.mxu0 %v2220_v15  ;;  %2094 = vmatprep.subr.bf16.mxu1 %v2221_v16  ;;  %v2444_v46 = vpack.c.bf16 %v283_v42, %v283_v42  ;;  %v292_v47 = vpack.c.bf16 %v2438_v43, %v2438_v43  ;;  %v1871_v48 = vpack.c.bf16 %v2438_v43, %v283_v42  ;;  %v1923_v15 = vld [vmem:[%s2396_s15 + $0x10] sm:$0xff]  }
  0x1a   : > { %v293_v49 = vpack.c.bf16 %v2440_v44, %v2440_v44  ;;  %v294_v50 = vpack.c.bf16 %v2442_v45, %v2442_v45  ;;  %v1872_v51 = vpack.c.bf16 %v2442_v45, %v2440_v44  ;;  %v1896_v32 = vunpack.c.l.bf16 %v1923_v15 }
  0x1b   : > { %v300_v52 = vshrl.u32 %v2444_v46, 16  ;;  %v303_v53 = vshll.u32 %v2444_v46, 16  ;;  %756 = vmatprep.mubr.bf16.mxu0 %v1871_v48  ;;  %v307_v54 = vshrl.u32 %v292_v47, 16  ;;  %v310_v55 = vshll.u32 %v292_v47, 16 }
  0x1c   : > { %1939 = vmatpush3.bf16.msra.mxu0 %v2222_v17  ;;  %2095 = vmatpush3.bf16.msra.mxu1 %v2221_v16  ;;  %v314_v56 = vshrl.u32 %v293_v49, 16  ;;  %v317_v57 = vshll.u32 %v293_v49, 16  ;;  %v321_v58 = vshrl.u32 %v294_v50, 16  ;;  %v324_v59 = vshll.u32 %v294_v50, 16 }
  0x1d   : > { %1940 = vmatprep.subr.bf16.mxu0 %v2223_v18  ;;  %2096 = vmatprep.subr.bf16.mxu1 %v2224_v19  ;;  %v302_v60 = vrot.slane %v300_v52, 7  ;;  %v309_v61 = vrot.slane %v307_v54, 7  ;;  %v374_v63 = vrot.slane %v303_v53, 1  ;;  %v376_v0 = vrot.slane %v310_v55, 1 }
  0x1e   : > { %v378_v1 = vrot.slane %v317_v57, 1  ;;  %v380_v3 = vrot.slane %v324_v59, 1  ;;  %v316_v4 = vrot.slane %v314_v56, 7  ;;  %v323_v5 = vrot.slane %v321_v58, 7 }
  0x1f   : > { %v305_v6 = vor.u32 %v303_v53, %v302_v60  ;;  %v312_v7 = vor.u32 %v310_v55, %v309_v61  ;;  %v375_v8 = vor.u32 %v374_v63, %v300_v52  ;;  %v377_v9 = vor.u32 %v376_v0, %v307_v54  ;;  %v2239_v54 = vld [vmem:[%s2775_s3 + $0x98] sm:$0xff]  }
  0x20   : > { %1941 = vmatpush3.bf16.msra.mxu0 %v2225_v20  ;;  %2097 = vmatpush3.bf16.msra.mxu1 %v2224_v19  ;;  %v379_v10 = vor.u32 %v378_v1, %v314_v56  ;;  %v381_v11 = vor.u32 %v380_v3, %v321_v58  ;;  %v319_v13 = vor.u32 %v317_v57, %v316_v4  ;;  %v1897_v33 = vunpack.c.h.bf16 %v1923_v15  ;;  %v2241_v1 = vld [vmem:[%s2775_s3 + $0x60] sm:$0xff]  }
  0x21   : > { %1942 = vmatprep.subr.bf16.mxu0 %v2226_v24  ;;  %2098 = vmatprep.subr.bf16.mxu1 %v2227_v25  ;;  %v326_v14 = vor.u32 %v324_v59, %v323_v5  ;;  %v2476_v16 = vsel %vm2460_vm4, 0, %v305_v6  ;;  %v2480_v17 = vsel %vm2460_vm4, 0, %v312_v7  ;;  %v2484_v18 = vsel %vm2466_vm5, %v375_v8, 0  ;;  %v2232_v24 = vld [vmem:[%s2775_s3 + $0x48] sm:$0xff]   ;;  %v2242_v3 = vld [vmem:[%s2775_s3 + $0xa0] sm:$0xff]  }
  0x22   : > { %v2488_v19 = vsel %vm2466_vm5, %v377_v9, 0  ;;  %v1712_v20 = vcombine.low %v2476_v16, %v2480_v17  ;;  %v2494_v21 = vsel %vm2466_vm5, %v379_v10, 0  ;;  %v2510_v27 = vsel %vm2460_vm4, 0, %v319_v13  ;;  %v2243_v4 = vld [vmem:[%s2775_s3 + $0x20] sm:$0xff]   ;;  %v2244_v10 = vld [vmem:[%s2775_s3 + $0x68] sm:$0xff]  }
  0x23   : > { %v1714_v22 = vcombine.low %v2484_v18, %v2488_v19  ;;  %v264_v35 = vmul.f32 %v1896_v32, %v2406_v23  ;;  %v265_v36 = vmul.f32 %v1897_v33, %v2406_v23 }
  0x24   : > { %1943 = vmatpush3.bf16.msra.mxu0 %v2228_v31  ;;  %2099 = vmatpush3.bf16.msra.mxu1 %v2227_v25  ;;  %v2503_v25 = vsel %vm2466_vm5, %v381_v11, 0  ;;  %v2519_v31 = vsel %vm2460_vm4, 0, %v326_v14 }
  0x25   : > { %1980 = vmatprep.subr.bf16.mxu0 %v2229_v39  ;;  %2108 = vmatprep.subr.bf16.mxu1 %v2435_v40  ;;  %v1717_v28 = vcombine.low %v2494_v21, %v2503_v25  ;;  %v1715_v37 = vcombine.low %v2510_v27, %v2519_v31  ;;  %v1924_v39 = vld [vmem:[%s2396_s15 + $0x18] sm:$0xff]   ;;  %v279_v42 = vadd.f32 %v2417_v30, %v264_v35  ;;  %v2246_v35 = vld [vmem:[%s2775_s3 + $0x28] sm:$0xff]  }
  0x26   : > { %2100 = vmatprep.mubr.bf16.mxu1 %v1714_v22  ;;  %v280_v47 = vadd.f32 %v2417_v30, %v265_v36  ;;  %v1900_v48 = vunpack.c.l.bf16 %v1924_v39  ;;  %v1901_v49 = vunpack.c.h.bf16 %v1924_v39 }
  0x27   : > { %757 = vmatmul.mubr.bf16.vlgmr.msra.gmra.mrb[0].mxu0 %v1712_v20  ;;  %2101 = vmatmul.mubr.bf16.vlgmr.msra.gmra.mrb[0].mxu1 %v1717_v28  ;;  %v2541_v50 = vmax.f32 %v279_v42, 0.0  ;;  %v2245_v20 = vld [vmem:[%s2775_s3 + $0xa8] sm:$0xff]  }
  0x28   : > { %1981 = vmatpush3.bf16.msra.mxu0 %v2231_v12  ;;  %764 = vmatprep.mubr.bf16.mxu0 %v1872_v51  ;;  %v2543_v51 = vmax.f32 %v280_v47, 0.0  ;;  %v266_v52 = vmul.f32 %v1900_v48, %v2406_v23  ;;  %v267_v53 = vmul.f32 %v1901_v49, %v2406_v23  ;;  %v2240_v23 = vld [vmem:[%s2775_s3 + $0x18] sm:$0xff]  }
  0x29   : > { %1982 = vmatprep.subr.bf16.mxu0 %v2232_v24  ;;  %2109 = vmatpush3.bf16.msra.mxu1 %v2435_v40  ;;  %v2238_v40 = vld [vmem:[%s2775_s3 + $0x58] sm:$0xff]   ;;  %v295_v56 = vpack.c.bf16 %v2541_v50, %v2541_v50 }
  0x2a   : > { %2110 = vmatprep.subr.bf16.mxu1 %v2233_v26  ;;  %v1873_v55 = vpack.c.bf16 %v2543_v51, %v2541_v50  ;;  %v296_v57 = vpack.c.bf16 %v2543_v51, %v2543_v51  ;;  %v281_v58 = vadd.f32 %v2417_v30, %v266_v52  ;;  %v282_v59 = vadd.f32 %v2417_v30, %v267_v53  ;;  %v2248_v53 = vld [vmem:[%s2775_s3 + $0xb0] sm:$0xff]  }
  0x2b   : > { %v328_v60 = vshrl.u32 %v295_v56, 16  ;;  %v331_v61 = vshll.u32 %v295_v56, 16 }
  0x2c   : > { %1983 = vmatpush3.bf16.msra.mxu0 %v2234_v29  ;;  %v335_v63 = vshrl.u32 %v296_v57, 16  ;;  %v338_v0 = vshll.u32 %v296_v57, 16  ;;  %v2570_v30 = vmax.f32 %v281_v58, 0.0  ;;  %v290_v5 = vmax.f32 %v282_v59, 0.0  ;;  %v2250_v58 = vld [vmem:[%s2775_s3 + $0x78] sm:$0xff]  }
  0x2d   : > { %1984 = vmatprep.subr.bf16.mxu0 %v2235_v34  ;;  %2111 = vmatpush3.bf16.msra.mxu1 %v2233_v26  ;;  %v330_v6 = vrot.slane %v328_v60, 7  ;;  %v382_v8 = vrot.slane %v331_v61, 1  ;;  %v2285_v59 = vmov 0  }
  0x2e   : > { %2112 = vmatprep.subr.bf16.mxu1 %v2236_v38  ;;  %v337_v7 = vrot.slane %v335_v63, 7  ;;  %v384_v9 = vrot.slane %v338_v0, 1  ;;  %v2575_v11 = vpack.c.bf16 %v290_v5, %v290_v5  ;;  %v1874_v12 = vpack.c.bf16 %v290_v5, %v2570_v30 }
  0x2f   : > { %765 = vmatmul.mubr.bf16.gmra.mrb[4].mxu0 %v1715_v37  ;;  %v297_v13 = vpack.c.bf16 %v2570_v30, %v2570_v30  ;;  %v333_v14 = vor.u32 %v331_v61, %v330_v6  ;;  %v383_v22 = vor.u32 %v382_v8, %v328_v60  ;;  %v1750_v60 = vcombine.low %v2285_v59, %v2484_v18  ;;  %v2251_v18 = vld [vmem:[%s2775_s3 + $0xb8] sm:$0xff]   ;;  %v2257_v8 = vld [vmem:[%s2775_s3 + $0x208] sm:$0xff]  }
  0x30   : > { %1985 = vmatpush3.bf16.msra.mxu0 %v2237_v41  ;;  %772 = vmatprep.mubr.bf16.mxu0 %v1873_v55  ;;  %v340_v15 = vor.u32 %v338_v0, %v337_v7  ;;  %v385_v24 = vor.u32 %v384_v9, %v335_v63  ;;  %v349_v29 = vshrl.u32 %v2575_v11, 16  ;;  %v352_v32 = vshll.u32 %v2575_v11, 16  ;;  %v2255_v7 = vld [vmem:[%s2775_s3 + $0x180] sm:$0xff]   ;;  %v2256_v9 = vld [vmem:[%s2775_s3 + $0x1c8] sm:$0xff]  }
  0x31   : > { %1986 = vmatprep.subr.bf16.mxu0 %v2238_v40  ;;  %2113 = vmatpush3.bf16.msra.mxu1 %v2236_v38  ;;  %v342_v26 = vshrl.u32 %v297_v13, 16  ;;  %v345_v28 = vshll.u32 %v297_v13, 16  ;;  %v2587_v33 = vsel %vm2460_vm4, 0, %v333_v14  ;;  %v405_v36 = vsel %vm2466_vm5, %v383_v22, 0  ;;  %v2247_v38 = vld [vmem:[%s2775_s3 + $0x70] sm:$0xff]   ;;  %v2263_v13 = vld [vmem:[%s2775_s3 + $0x218] sm:$0xff]  }
  0x32   : > { %2114 = vmatprep.subr.bf16.mxu1 %v2239_v54  ;;  %v2591_v34 = vsel %vm2460_vm4, 0, %v340_v15  ;;  %v2600_v37 = vsel %vm2466_vm5, %v385_v24, 0  ;;  %v351_v42 = vrot.slane %v349_v29, 7  ;;  %v388_v49 = vrot.slane %v352_v32, 1  ;;  %v2262_v14 = vld [vmem:[%s2775_s3 + $0x1d8] sm:$0xff]   ;;  %v2269_v22 = vld [vmem:[%s2775_s3 + $0x228] sm:$0xff]  }
  0x33   : > { %v1718_v39 = vcombine.low %v2587_v33, %v2591_v34  ;;  %v344_v41 = vrot.slane %v342_v26, 7  ;;  %v1720_v47 = vcombine.low %v405_v36, %v2600_v37  ;;  %v386_v48 = vrot.slane %v345_v28, 1  ;;  %v2268_v24 = vld [vmem:[%s2775_s3 + $0x1e8] sm:$0xff]  }
  0x34   : > { %1987 = vmatpush3.bf16.msra.mxu0 %v2240_v23  ;;  %v354_v52 = vor.u32 %v352_v32, %v351_v42  ;;  %v389_v55 = vor.u32 %v388_v49, %v349_v29  ;;  %v2249_v23 = vld [vmem:[%s2775_s3 + $0x30] sm:$0xff]   ;;  %v1753_v5 = vcombine.low %v2488_v19, %v2494_v21  ;;  %v1748_v6 = vcombine.low %v2285_v59, %v2476_v16  ;;  %v2258_v21 = vld [vmem:[%s2775_s3 + $0x188] sm:$0xff]   ;;  %v2275_v32 = vld [vmem:[%s2775_s3 + $0x238] sm:$0xff]  }
  0x35   : > { %1988 = vmatprep.subr.bf16.mxu0 %v2241_v1  ;;  %2115 = vmatpush3.bf16.msra.mxu1 %v2239_v54  ;;  %v347_v40 = vor.u32 %v345_v28, %v344_v41  ;;  %v387_v54 = vor.u32 %v386_v48, %v342_v26  ;;  %v2665_v19 = vpack.c.bf16 %v2440_v44, %v2438_v43  ;;  %v2259_v43 = vld [vmem:[%s2775_s3 + $0x1d0] sm:$0xff]  }
  0x36   : > { %2116 = vmatprep.subr.bf16.mxu1 %v2242_v3  ;;  %v373_v57 = vsel %vm2460_vm4, 0, %v354_v52  ;;  %2104 = vmatprep.mubr.bf16.mxu1 %v1720_v47  ;;  %v2629_v62 = vsel %vm2466_vm5, %v389_v55, 0  ;;  %v2668_v16 = vcombine.low %v2503_v25, %v405_v36  ;;  %v1751_v25 = vcombine.low %v2480_v17, %v2510_v27  ;;  %v2264_v17 = vld [vmem:[%s2775_s3 + $0x198] sm:$0xff]   ;;  %v2266_v27 = vld [vmem:[%s2775_s3 + $0x220] sm:$0xff]   ;;  %v2272_v28 = vld [vmem:[%s2775_s3 + $0x230] sm:$0xff]  }
  0x37   : > { %773 = vmatmul.mubr.bf16.gmra.mrb[8].mxu0 %v1718_v39  ;;  %v2613_v56 = vsel %vm2460_vm4, 0, %v347_v40  ;;  %v407_v61 = vsel %vm2466_vm5, %v387_v54, 0  ;;  %v2634_v1 = vcombine.low %v373_v57, %v2285_v59  ;;  %v1876_v15 = vpack.c.bf16 %v2541_v50, %v2442_v45  ;;  %v2267_v50 = vld [vmem:[%s2775_s3 + $0x1a0] sm:$0xff]   ;;  %v2271_v29 = vld [vmem:[%s2775_s3 + $0x1f0] sm:$0xff]  }
  0x38   : > { %1989 = vmatpush3.bf16.msra.mxu0 %v2243_v4  ;;  %780 = vmatprep.mubr.bf16.mxu0 %v1874_v12  ;;  %v1721_v63 = vcombine.low %v2613_v56, %v373_v57  ;;  %v1723_v0 = vcombine.low %v407_v61, %v2629_v62  ;;  %v2253_v4 = vld [vmem:[%s2775_s3 + $0x1c0] sm:$0xff]   ;;  %v1759_v44 = vcombine.low %v2600_v37, %v407_v61  ;;  %v2261_v12 = vld [vmem:[%s2775_s3 + $0x190] sm:$0xff]  }
  0x39   : > { %1990 = vmatprep.subr.bf16.mxu0 %v2244_v10  ;;  %2117 = vmatpush3.bf16.msra.mxu1 %v2242_v3  ;;  %v1749_v3 = vcombine.low %v2285_v59, %v2444_v46  ;;  %v2254_v46 = vld [vmem:[%s2775_s3 + $0x200] sm:$0xff]   ;;  %v2260_v10 = vld [vmem:[%s2775_s3 + $0x210] sm:$0xff]   ;;  %v1754_v45 = vcombine.low %v2519_v31, %v2587_v33  ;;  %v1877_v26 = vpack.c.bf16 %v2570_v30, %v2543_v51  ;;  %v2270_v31 = vld [vmem:[%s2775_s3 + $0x1a8] sm:$0xff]  }
  0x3a   : > { %2118 = vmatprep.subr.bf16.mxu1 %v2245_v20  ;;  %2105 = vmatmul.mubr.bf16.gmra.mrb[4].mxu1 %v1723_v0  ;;  %v1757_v51 = vcombine.low %v2591_v34, %v2613_v56  ;;  %v2273_v30 = vld [vmem:[%s2775_s3 + $0x1b0] sm:$0xff]   ;;  %v2274_v33 = vld [vmem:[%s2775_s3 + $0x1f8] sm:$0xff]   ;;  %v1833_v36 = vcombine.low %v2575_v11, %v2285_v59 }
  0x3b   : > { %2124 = vmatprep.mubr.bf16.mxu1 %v1750_v60  ;;  %v2276_v34 = vld [vmem:[%s2775_s3 + $0x1b8] sm:$0xff]  }
  0x3c   : > { %1991 = vmatpush3.bf16.msra.mxu0 %v2246_v35  ;;  %v1834_v35 = vcombine.low %v2629_v62, %v2285_v59 }
  0x3d   : > { %1992 = vmatprep.subr.bf16.mxu0 %v2247_v38  ;;  %2119 = vmatpush3.bf16.msra.mxu1 %v2245_v20  ;;  %v2265_v20 = vld [vmem:[%s2775_s3 + $0x1e0] sm:$0xff]  }
  0x3e   : > { %2120 = vmatprep.subr.bf16.mxu1 %v2248_v53 }
  0x3f   : > { %781 = vmatmul.mubr.bf16.gmra.mrb[12].mxu0 %v1721_v63 }
  0x40   : > { %1993 = vmatpush3.bf16.msra.mxu0 %v2249_v23  ;;  %1054 = vmatprep.mubr.bf16.mxu0 %v1749_v3 }
  0x41   : > { %1994 = vmatprep.subr.bf16.mxu0 %v2250_v58  ;;  %2121 = vmatpush3.bf16.msra.mxu1 %v2248_v53 }
  0x42   : > { %2122 = vmatprep.subr.bf16.mxu1 %v2251_v18 }
  0x44   : > { %1995 = vmatpush3.bf16.msra.mxu0 %v2252_v2 }
  0x45   : > { %2032 = vmatprep.subr.bf16.mxu0 %v2253_v4  ;;  %2123 = vmatpush3.bf16.msra.mxu1 %v2251_v18 }
  0x46   : > { %2132 = vmatprep.subr.bf16.mxu1 %v2254_v46 }
  0x47   : > { %1055 = vmatmul.mubr.bf16.vlgmr.msra.gmra.mrb[16].mxu0 %v1748_v6 }
  0x48   : > { %2125 = vmatmul.mubr.bf16.vlgmr.msra.gmra.mrb[0].mxu1 %v1753_v5  ;;  %2033 = vmatpush3.bf16.msra.mxu0 %v2255_v7 }
  0x49   : > { %2133 = vmatpush3.bf16.msra.mxu1 %v2254_v46  ;;  %2034 = vmatprep.subr.bf16.mxu0 %v2256_v9 }
  0x4a   : > { %2134 = vmatprep.subr.bf16.mxu1 %v2257_v8  ;;  %1062 = vmatprep.mubr.bf16.mxu0 %v2665_v19 }
  0x4b   : > { %2128 = vmatprep.mubr.bf16.mxu1 %v2668_v16 }
  0x4c   : > { %2035 = vmatpush3.bf16.msra.mxu0 %v2258_v21 }
  0x4d   : > { %2135 = vmatpush3.bf16.msra.mxu1 %v2257_v8  ;;  %2036 = vmatprep.subr.bf16.mxu0 %v2259_v43 }
  0x4e   : > { %2136 = vmatprep.subr.bf16.mxu1 %v2260_v10 }
  0x4f   : > { %1063 = vmatmul.mubr.bf16.gmra.mrb[20].mxu0 %v1751_v25 }
  0x50   : > { %2129 = vmatmul.mubr.bf16.gmra.mrb[4].mxu1 %v1759_v44  ;;  %2037 = vmatpush3.bf16.msra.mxu0 %v2261_v12 }
  0x51   : > { %2137 = vmatpush3.bf16.msra.mxu1 %v2260_v10  ;;  %2038 = vmatprep.subr.bf16.mxu0 %v2262_v14 }
  0x52   : > { %2138 = vmatprep.subr.bf16.mxu1 %v2263_v13  ;;  %1070 = vmatprep.mubr.bf16.mxu0 %v1876_v15 }
  0x53   : > { %2148 = vmatprep.mubr.bf16.mxu1 %v1753_v5 }
  0x54   : > { %2039 = vmatpush3.bf16.msra.mxu0 %v2264_v17 }
  0x55   : > { %2139 = vmatpush3.bf16.msra.mxu1 %v2263_v13  ;;  %2040 = vmatprep.subr.bf16.mxu0 %v2265_v20 }
  0x56   : > { %2140 = vmatprep.subr.bf16.mxu1 %v2266_v27 }
  0x57   : > { %1071 = vmatmul.mubr.bf16.gmra.mrb[24].mxu0 %v1754_v45 }
  0x58   : > { %2041 = vmatpush3.bf16.msra.mxu0 %v2267_v50  ;;  %1078 = vmatprep.mubr.bf16.mxu0 %v1877_v26 }
  0x59   : > { %2141 = vmatpush3.bf16.msra.mxu1 %v2266_v27  ;;  %2042 = vmatprep.subr.bf16.mxu0 %v2268_v24 }
  0x5a   : > { %2142 = vmatprep.subr.bf16.mxu1 %v2269_v22 }
  0x5c   : > { %2043 = vmatpush3.bf16.msra.mxu0 %v2270_v31 }
  0x5d   : > { %2143 = vmatpush3.bf16.msra.mxu1 %v2269_v22  ;;  %2044 = vmatprep.subr.bf16.mxu0 %v2271_v29 }
  0x5e   : > { %2144 = vmatprep.subr.bf16.mxu1 %v2272_v28 }
  0x5f   : > { %1079 = vmatmul.mubr.bf16.gmra.mrb[28].mxu0 %v1757_v51 }
  0x60   : > { %2045 = vmatpush3.bf16.msra.mxu0 %v2273_v30  ;;  %1383 = vmatprep.mubr.bf16.mxu0 %v2665_v19 }
  0x61   : > { %2145 = vmatpush3.bf16.msra.mxu1 %v2272_v28  ;;  %2046 = vmatprep.subr.bf16.mxu0 %v2274_v33 }
  0x62   : > { %2146 = vmatprep.subr.bf16.mxu1 %v2275_v32 }
  0x64   : > { %2047 = vmatpush3.bf16.msra.mxu0 %v2276_v34 }
  0x65   : > { %2147 = vmatpush3.bf16.msra.mxu1 %v2275_v32 }
  0x67   : > { %1384 = vmatmul.mubr.bf16.vlgmr.msra.gmra.mrb[32].mxu0 %v1751_v25 }
  0x68   : > { %2149 = vmatmul.mubr.bf16.vlgmr.msra.gmra.mrb[0].mxu1 %v2668_v16  ;;  %1391 = vmatprep.mubr.bf16.mxu0 %v1876_v15 }
  0x69   : > { %2152 = vmatprep.mubr.bf16.mxu1 %v1759_v44 }
  0x6f   : > { %1392 = vmatmul.mubr.bf16.gmra.mrb[36].mxu0 %v1754_v45 }
  0x70   : > { %2153 = vmatmul.mubr.bf16.gmra.mrb[4].mxu1 %v1834_v35  ;;  %1399 = vmatprep.mubr.bf16.mxu0 %v1877_v26 }
  0x77   : > { %1400 = vmatmul.mubr.bf16.gmra.mrb[40].mxu0 %v1757_v51 }
  0x78   : > { %1407 = vmatprep.mubr.bf16.mxu0 %v1833_v36 }
  0x7f   : > { %1408 = vmatmul.mubr.bf16.gmra.mrb[44].mxu0 %v2634_v1 }
  0xfa   : > { %v1944_v37 = vpop.f32.mrb[0].mxu0 }
  0xfb   : > { %v1945_v38 = vpop.f32.mrb[1].mxu0 }
  0xfc   : > { %v1946_v39 = vadd.f32 %v1945_v38, %v1944_v37  ;;  %v1947_v41 = vpop.f32.mrb[2].mxu0 }
  0xfd   : > { %v1948_v42 = vpop.f32.mrb[3].mxu0 }
  0xfe   : > { %v1949_v47 = vadd.f32 %v1948_v42, %v1947_v41 }
 0x102   : > { %v1950_v48 = vpop.f32.mrb[4].mxu0 }
 0x103   : > { %v1951_v49 = vpop.f32.mrb[5].mxu0 }
 0x104   : > { %v1952_v40 = vadd.f32 %v1951_v49, %v1950_v48  ;;  %v1953_v52 = vpop.f32.mrb[6].mxu0 }
 0x105   : > { %v1954_v53 = vpop.f32.mrb[7].mxu0 }
 0x106   : > { %v1955_v54 = vadd.f32 %v1954_v53, %v1953_v52 }
 0x10a   : > { %v1956_v55 = vpop.f32.mrb[8].mxu0 }
 0x10b   : > { %v1957_v56 = vpop.f32.mrb[9].mxu0 }
 0x10c   : > { %v1958_v57 = vadd.f32 %v1957_v56, %v1956_v55  ;;  %v1959_v11 = vpop.f32.mrb[10].mxu0 }
 0x10d   : > { %v1960_v23 = vpop.f32.mrb[11].mxu0 }
 0x10e   : > { %v1961_v58 = vadd.f32 %v1960_v23, %v1959_v11 }
 0x112   : > { %v1962_v59 = vpop.f32.mrb[12].mxu0 }
 0x113   : > { %v1963_v60 = vpop.f32.mrb[13].mxu0 }
 0x114   : > { %v1964_v61 = vadd.f32 %v1963_v60, %v1962_v59  ;;  %v1965_v62 = vpop.f32.mrb[14].mxu0 }
 0x115   : > { %v1966_v63 = vpop.f32.mrb[15].mxu0 }
 0x116   : > { %v1967_v0 = vadd.f32 %v1966_v63, %v1965_v62 }
 0x11a   : > { %v1996_v1 = vpop.f32.mrb[16].mxu0 }
 0x11b   : > { %v1997_v18 = vpop.f32.mrb[17].mxu0 }
 0x11c   : > { %v1998_v3 = vadd.f32 %v1997_v18, %v1996_v1  ;;  %v1999_v2 = vpop.f32.mrb[18].mxu0 }
 0x11d   : > { %v2000_v4 = vpop.f32.mrb[19].mxu0 }
 0x11e   : > { %v2159_v46 = vadd.f32 %v1998_v3, %v1946_v39  ;;  %v2001_v5 = vadd.f32 %v2000_v4, %v1999_v2 }
 0x120   : > { %v2165_v6 = vadd.f32 %v2001_v5, %v1949_v47 }
 0x122   : > { %v2002_v7 = vpop.f32.mrb[20].mxu0 }
 0x123   : > { %v2003_v8 = vpop.f32.mrb[21].mxu0 }
 0x124   : > { %v2004_v9 = vadd.f32 %v2003_v8, %v2002_v7  ;;  %v2005_v19 = vpop.f32.mrb[22].mxu0 }
 0x125   : > { %v2006_v16 = vpop.f32.mrb[23].mxu0 }
 0x126   : > { %v2156_v21 = vadd.f32 %v2004_v9, %v1952_v40  ;;  %v2007_v10 = vadd.f32 %v2006_v16, %v2005_v19 }
 0x128   : > { %v2162_v43 = vadd.f32 %v2007_v10, %v1955_v54 }
 0x12a   : > { %v2008_v44 = vpop.f32.mrb[24].mxu0 }
 0x12b   : > { %v2009_v25 = vpop.f32.mrb[25].mxu0 }
 0x12c   : > { %v2010_v12 = vadd.f32 %v2009_v25, %v2008_v44  ;;  %v2011_v13 = vpop.f32.mrb[26].mxu0 }
 0x12d   : > { %v2012_v14 = vpop.f32.mrb[27].mxu0 }
 0x12e   : > { %v2171_v15 = vadd.f32 %v2010_v12, %v1958_v57  ;;  %v2013_v17 = vadd.f32 %v2012_v14, %v2011_v13 }
 0x130   : > { %v2177_v27 = vadd.f32 %v2013_v17, %v1961_v58 }
 0x132   : > { %v2014_v20 = vpop.f32.mrb[28].mxu0 }
 0x133   : > { %v2015_v45 = vpop.f32.mrb[29].mxu0 }
 0x134   : > { %v2016_v50 = vadd.f32 %v2015_v45, %v2014_v20  ;;  %v2017_v22 = vpop.f32.mrb[30].mxu0 }
 0x135   : > { %v2018_v24 = vpop.f32.mrb[31].mxu0 }
 0x136   : > { %v2747_v26 = vadd.f32 %v2016_v50, %v1964_v61  ;;  %v2019_v31 = vadd.f32 %v2018_v24, %v2017_v22 }
 0x138   : > { %v2749_v28 = vadd.f32 %v2019_v31, %v1967_v0 }
 0x13a   : > { %v2048_v51 = vpop.f32.mrb[32].mxu0 }
 0x13b   : > { %v2150_v29 = vpop.f32.mrb[0].mxu1  ;;  %v2049_v32 = vpop.f32.mrb[33].mxu0 }
 0x13c   : > { %v1450_v30 = vpop.f32.mrb[1].mxu1  ;;  %v2050_v34 = vadd.f32 %v2049_v32, %v2048_v51  ;;  %v2051_v35 = vpop.f32.mrb[34].mxu0 }
 0x13d   : > { %v2151_v33 = vpop.f32.mrb[2].mxu1  ;;  %v2052_v37 = vpop.f32.mrb[35].mxu0 }
 0x13e   : > { %v1453_v36 = vpop.f32.mrb[3].mxu1  ;;  %v2160_v38 = vadd.f32 %v2159_v46, %v2050_v34  ;;  %v2053_v39 = vadd.f32 %v2052_v37, %v2051_v35 }
 0x140   : > { %v2161_v41 = vadd.f32 %v2160_v38, %v1450_v30  ;;  %v2166_v42 = vadd.f32 %v2165_v6, %v2053_v39 }
 0x142   : > { %v2167_v48 = vadd.f32 %v2166_v42, %v1453_v36  ;;  %v2054_v49 = vpop.f32.mrb[36].mxu0  ;;  %v1542_v52 = vmul.f32 %v2161_v41, %v2161_v41 }
 0x143   : > { %v2154_v47 = vpop.f32.mrb[4].mxu1  ;;  %v2055_v53 = vpop.f32.mrb[37].mxu0 }
 0x144   : > { %v1466_v40 = vpop.f32.mrb[5].mxu1  ;;  %v1905_v55 = vpack.c.bf16 %v2167_v48, %v2161_v41  ;;  %v1529_v56 = vadd.f32 %v2167_v48, %v2161_v41  ;;  %v1543_v57 = vmul.f32 %v2167_v48, %v2167_v48  ;;  %v2056_v11 = vadd.f32 %v2055_v53, %v2054_v49  ;;  %v2057_v23 = vpop.f32.mrb[38].mxu0 }
 0x145   : > { %v2155_v54 = vpop.f32.mrb[6].mxu1  ;;  %v2058_v59 = vpop.f32.mrb[39].mxu0 }
 0x146   : > { %v1469_v58 = vpop.f32.mrb[7].mxu1  ;;  %1906 = vst [vmem:[%s2756_s17] sm:$0xff] %v1905_v55   ;;  %v1550_v60 = vadd.f32 %v1543_v57, %v1542_v52  ;;  %v2157_v61 = vadd.f32 %v2156_v21, %v2056_v11  ;;  %v2059_v62 = vadd.f32 %v2058_v59, %v2057_v23 }
 0x148   : > { %v2158_v63 = vadd.f32 %v2157_v61, %v2150_v29  ;;  %v2163_v0 = vadd.f32 %v2162_v43, %v2059_v62 }
 0x14a   : > { %v1530_v1 = vadd.f32 %v2158_v63, %v1529_v56  ;;  %v1544_v18 = vmul.f32 %v2158_v63, %v2158_v63  ;;  %v2164_v3 = vadd.f32 %v2163_v0, %v2151_v33  ;;  %v2060_v2 = vpop.f32.mrb[40].mxu0 }
 0x14b   : > { %v2061_v4 = vpop.f32.mrb[41].mxu0 }
 0x14c   : > { %v1551_v46 = vadd.f32 %v1550_v60, %v1544_v18  ;;  %v1910_v5 = vpack.c.bf16 %v2164_v3, %v2158_v63  ;;  %v1531_v6 = vadd.f32 %v2164_v3, %v1530_v1  ;;  %v1545_v7 = vmul.f32 %v2164_v3, %v2164_v3  ;;  %v2063_v8 = vpop.f32.mrb[42].mxu0 }
 0x14d   : > { %v2062_v9 = vadd.f32 %v2061_v4, %v2060_v2  ;;  %v2064_v19 = vpop.f32.mrb[43].mxu0 }
 0x14e   : > { %1925 = vst [vmem:[%s2756_s17 + $0x8] sm:$0xff] %v1910_v5   ;;  %v1552_v16 = vadd.f32 %v1551_v46, %v1545_v7  ;;  %v2065_v10 = vadd.f32 %v2064_v19, %v2063_v8 }
 0x14f   : > { %v2172_v21 = vadd.f32 %v2171_v15, %v2062_v9 }
 0x150   : > { %v2178_v44 = vadd.f32 %v2177_v27, %v2065_v10 }
 0x151   : > { %v2173_v25 = vadd.f32 %v2172_v21, %v1466_v40 }
 0x152   : > { %v2179_v43 = vadd.f32 %v2178_v44, %v1469_v58  ;;  %v2066_v12 = vpop.f32.mrb[44].mxu0 }
 0x153   : > { %v1532_v13 = vadd.f32 %v2173_v25, %v1531_v6  ;;  %v1546_v14 = vmul.f32 %v2173_v25, %v2173_v25  ;;  %v2067_v17 = vpop.f32.mrb[45].mxu0 }
 0x154   : > { %v1915_v20 = vpack.c.bf16 %v2179_v43, %v2173_v25  ;;  %v1547_v45 = vmul.f32 %v2179_v43, %v2179_v43  ;;  %v2068_v50 = vadd.f32 %v2067_v17, %v2066_v12  ;;  %v2069_v22 = vpop.f32.mrb[46].mxu0 }
 0x155   : > { %v1553_v24 = vadd.f32 %v1552_v16, %v1546_v14  ;;  %v1533_v31 = vadd.f32 %v2179_v43, %v1532_v13  ;;  %v2070_v29 = vpop.f32.mrb[47].mxu0 }
 0x156   : > { %1926 = vst [vmem:[%s2756_s17 + $0x10] sm:$0xff] %v1915_v20   ;;  %v2169_v51 = vadd.f32 %v2747_v26, %v2068_v50  ;;  %v2071_v30 = vadd.f32 %v2070_v29, %v2069_v22 }
 0x157   : > { %v1554_v15 = vadd.f32 %v1553_v24, %v1547_v45 }
 0x158   : > { %v2170_v27 = vadd.f32 %v2169_v51, %v2154_v47  ;;  %v2175_v32 = vadd.f32 %v2749_v28, %v2071_v30 }
 0x15a   : > { %v1534_v33 = vadd.f32 %v2170_v27, %v1533_v31  ;;  %v1548_v34 = vmul.f32 %v2170_v27, %v2170_v27  ;;  %v2176_v35 = vadd.f32 %v2175_v32, %v2155_v54 }
 0x15c   : > { %v1555_v36 = vadd.f32 %v1554_v15, %v1548_v34  ;;  %v1920_v37 = vpack.c.bf16 %v2176_v35, %v2170_v27  ;;  %v1535_v38 = vadd.f32 %v2176_v35, %v1534_v33  ;;  %v1549_v39 = vmul.f32 %v2176_v35, %v2176_v35 }
 0x15e   : > { %1927 = vst [vmem:[%s2756_s17 + $0x18] sm:$0xff] %v1920_v37   ;;  %v1536_v41 = vrot.slane %v1535_v38, 4  ;;  %v1556_v42 = vadd.f32 %v1555_v36, %v1549_v39 }
 0x160   : > { %v1537_v48 = vadd.f32 %v1536_v41, %v1535_v38  ;;  %v1557_v49 = vrot.slane %v1556_v42, 4 }
 0x162   : > { %v1538_v40 = vrot.slane %v1537_v48, 2  ;;  %v1558_v26 = vadd.f32 %v1557_v49, %v1556_v42 }
 0x164   : > { %v1539_v52 = vadd.f32 %v1538_v40, %v1537_v48  ;;  %v1559_v53 = vrot.slane %v1558_v26, 2 }
 0x166   : > { %v1540_v47 = vrot.slane %v1539_v52, 1  ;;  %v1560_v55 = vadd.f32 %v1559_v53, %v1558_v26 }
 0x168   : > { %v1561_v28 = vrot.slane %v1560_v55, 1  ;;  %v1541_v54 = vadd.f32 %v1540_v47, %v1539_v52 }
 0x16a   : > { %v1562_v56 = vadd.f32 %v1561_v28, %v1560_v55 }
 0x16c   : > { %v1564_v57 = vsel %vm363_vm1, %v1541_v54, %v1562_v56 }
 0x16d   : > { %1565 = vst [vmem:[%s235_s22] sm:$0x3] %v1564_v57 }
 0x16e PF: > { %s16_s18 = sadd.s32 1, %s2283_s18  }
 0x16f   : > { %p13_p4 = scmp.ge.s32.totalorder %s16_s18, 4  }
 0x171   :  { %15 = sbr.rel (!%p13_p4) target bundleno = 1 (0x1), region = 80 }

</bundles_post_ra>
